<compile_context>
chip_gen: v6e
topology: v6e:2x2x1
jax: 0.10.0
libtpu: 0.0.40
codegen_flags: <defaults>
</compile_context>

<pallas_src>
import functools
import math

import jax
import jax.numpy as jnp
from jax.experimental import pallas as pl
from jax.experimental.pallas import tpu as pltpu

_EPS = 1e-5  # torch.nn.LayerNorm default


# --------------------------------------------------------------------------
# Fused Pallas kernel: all layers + final LayerNorm
# --------------------------------------------------------------------------
def _fused_kernel(x_ref, wqkv_ref, wout_ref, bout_ref,
                  ln_g_ref, ln_b_ref, w1_ref, b1_ref, w2_ref, b2_ref,
                  fin_g_ref, fin_b_ref, o_ref, state_ref,
                  *, heads, head_dim, dp, c_true):
    l = pl.program_id(1)                       # layer index (arbitrary axis)
    bt, n, cp = state_ref.shape
    m = bt * n
    hp = heads * dp
    scale = jnp.float32(head_dim ** -0.5)
    inv_c = jnp.float32(1.0 / c_true)
    inv_sqrt2 = jnp.float32(1.0 / math.sqrt(2.0))

    # channel mask for LayerNorm statistics over the true (unpadded) channels
    lane = jax.lax.broadcasted_iota(jnp.int32, (1, cp), 1)
    cmask = (lane < c_true).astype(jnp.float32)

    @pl.when(l == 0)
    def _():
        state_ref[...] = x_ref[...].astype(jnp.float32)

    x3 = state_ref[...]                        # (bt, n, cp) f32 running state
    x2 = x3.reshape(m, cp)
    x2b = x2.astype(jnp.bfloat16)

    # ---- multi-head attention (no pre-norm, matching the PyTorch module) ----
    qkv = jnp.dot(x2b, wqkv_ref[0],
                  preferred_element_type=jnp.float32)          # (m, 3*hp)
    qkv3 = qkv.reshape(bt, n, 3 * hp)
    wout_all = wout_ref[0]                                     # (heads, dp, cp)

    attn_acc = jnp.zeros((m, cp), jnp.float32)
    for h in range(heads):                                     # small static loop
        q = qkv3[:, :, h * dp:(h + 1) * dp].astype(jnp.bfloat16)
        k = qkv3[:, :, hp + h * dp:hp + (h + 1) * dp].astype(jnp.bfloat16)
        v = qkv3[:, :, 2 * hp + h * dp:2 * hp + (h + 1) * dp].astype(jnp.bfloat16)
        s = jnp.einsum('bnd,bmd->bnm', q, k,
                       preferred_element_type=jnp.float32) * scale  # (bt, n, n)
        s = s - jnp.max(s, axis=-1, keepdims=True)
        e = jnp.exp(s)
        p = e * pl.reciprocal(jnp.sum(e, axis=-1, keepdims=True), approx=True)
        o_h = jnp.einsum('bnm,bmd->bnd', p.astype(jnp.bfloat16), v,
                         preferred_element_type=jnp.float32)        # (bt, n, dp)
        # accumulate the per-head out-projection (no lane-shuffle concat)
        attn_acc = attn_acc + jnp.dot(
            o_h.reshape(m, dp).astype(jnp.bfloat16), wout_all[h],
            preferred_element_type=jnp.float32)

    x1 = attn_acc + bout_ref[0] + x2           # residual 1, (m, cp) f32

    # ---- feed-forward: LayerNorm -> Linear -> GELU (exact) -> Linear ----
    mu = jnp.sum(x1, axis=-1, keepdims=True) * inv_c
    d = (x1 - mu) * cmask
    var = jnp.sum(d * d, axis=-1, keepdims=True) * inv_c
    xn = d * jax.lax.rsqrt(var + _EPS) * ln_g_ref[0] + ln_b_ref[0]
    h1 = jnp.dot(xn.astype(jnp.bfloat16), w1_ref[0],
                 preferred_element_type=jnp.float32) + b1_ref[0]
    g = 0.5 * h1 * (1.0 + jax.lax.erf(h1 * inv_sqrt2))
    h2 = jnp.dot(g.astype(jnp.bfloat16), w2_ref[0],
                 preferred_element_type=jnp.float32) + b2_ref[0]
    x_new = h2 + x1                            # residual 2

    state_ref[...] = x_new.reshape(bt, n, cp)

    # ---- final LayerNorm fused into the last layer's epilogue ----
    @pl.when(l == pl.num_programs(1) - 1)
    def _():
        mu2 = jnp.sum(x_new, axis=-1, keepdims=True) * inv_c
        d2 = (x_new - mu2) * cmask
        var2 = jnp.sum(d2 * d2, axis=-1, keepdims=True) * inv_c
        y = d2 * jax.lax.rsqrt(var2 + _EPS) * fin_g_ref[...] + fin_b_ref[...]
        o_ref[...] = y.reshape(bt, n, cp).astype(o_ref.dtype)


# --------------------------------------------------------------------------
# Wrapper: pad to lane-dense shapes, stack layer weights, one pallas_call
# --------------------------------------------------------------------------
def _round_up(v, m):
    return (v + m - 1) // m * m


def transformer_forward(x, layer_params, final_g, final_b, *, heads, head_dim):
    B, N, C = x.shape
    depth = len(layer_params)
    F = layer_params[0]["w1"].shape[1]

    Cp = _round_up(C, 128)
    Fp = _round_up(F, 128)
    Dp = _round_up(head_dim, 128)
    HP = heads * Dp

    # batch tile: largest divisor of B with Bt*N <= 512 rows per grid step
    Bt = 1
    for cand in range(1, B + 1):
        if B % cand == 0 and cand * N <= 512:
            Bt = cand

    def pad_qkv(w):                     # (C, 3H) -> (Cp, 3*HP), head-padded
        wq, wk, wv = jnp.split(w, 3, axis=1)

        def ph(mat):
            mat = mat.reshape(C, heads, head_dim)
            mat = jnp.pad(mat, ((0, Cp - C), (0, 0), (0, Dp - head_dim)))
            return mat.reshape(Cp, HP)

        return jnp.concatenate([ph(wq), ph(wk), ph(wv)], axis=1)

    def pad_out(w):                     # (H, C) -> (heads, Dp, Cp)
        mat = w.reshape(heads, head_dim, C)
        return jnp.pad(mat, ((0, 0), (0, Dp - head_dim), (0, Cp - C)))

    def padc(v):                        # (1, C) -> (1, Cp)
        return jnp.pad(v, ((0, 0), (0, Cp - C)))

    wqkv = jnp.stack([pad_qkv(p["wqkv"]) for p in layer_params]).astype(jnp.bfloat16)
    wout = jnp.stack([pad_out(p["wout"]) for p in layer_params]).astype(jnp.bfloat16)
    bout = jnp.stack([padc(p["bout"]) for p in layer_params])
    ln_g = jnp.stack([padc(p["ln_g"]) for p in layer_params])
    ln_b = jnp.stack([padc(p["ln_b"]) for p in layer_params])
    w1 = jnp.stack([jnp.pad(p["w1"], ((0, Cp - C), (0, Fp - F)))
                    for p in layer_params]).astype(jnp.bfloat16)
    b1 = jnp.stack([jnp.pad(p["b1"], ((0, 0), (0, Fp - F))) for p in layer_params])
    w2 = jnp.stack([jnp.pad(p["w2"], ((0, Fp - F), (0, Cp - C)))
                    for p in layer_params]).astype(jnp.bfloat16)
    b2 = jnp.stack([padc(p["b2"]) for p in layer_params])
    fin_g = padc(final_g)
    fin_b = padc(final_b)
    x_p = jnp.pad(x, ((0, 0), (0, 0), (0, Cp - C))).astype(jnp.float32)

    kernel = functools.partial(_fused_kernel, heads=heads, head_dim=head_dim,
                               dp=Dp, c_true=C)

    def const_spec(shape):
        n = len(shape)
        return pl.BlockSpec(shape, lambda *args, n=n: (0,) * n)

    out = pl.pallas_call(
        kernel,
        out_shape=jax.ShapeDtypeStruct((B, N, Cp), jnp.float32),
        grid=(B // Bt, depth),
        in_specs=[
            pl.BlockSpec((Bt, N, Cp), lambda bb, l: (bb, 0, 0)),        # x
            pl.BlockSpec((1, Cp, 3 * HP), lambda bb, l: (l, 0, 0)),     # wqkv
            pl.BlockSpec((1, heads, Dp, Cp), lambda bb, l: (l, 0, 0, 0)),  # wout
            pl.BlockSpec((1, 1, Cp), lambda bb, l: (l, 0, 0)),          # bout
            pl.BlockSpec((1, 1, Cp), lambda bb, l: (l, 0, 0)),          # ln_g
            pl.BlockSpec((1, 1, Cp), lambda bb, l: (l, 0, 0)),          # ln_b
            pl.BlockSpec((1, Cp, Fp), lambda bb, l: (l, 0, 0)),         # w1
            pl.BlockSpec((1, 1, Fp), lambda bb, l: (l, 0, 0)),          # b1
            pl.BlockSpec((1, Fp, Cp), lambda bb, l: (l, 0, 0)),         # w2
            pl.BlockSpec((1, 1, Cp), lambda bb, l: (l, 0, 0)),          # b2
            const_spec((1, Cp)),                                        # fin_g
            const_spec((1, Cp)),                                        # fin_b
        ],
        out_specs=pl.BlockSpec((Bt, N, Cp), lambda bb, l: (bb, 0, 0)),
        scratch_shapes=[pltpu.VMEM((Bt, N, Cp), jnp.float32)],
        compiler_params=pltpu.CompilerParams(
            dimension_semantics=("parallel", "arbitrary")),
    )(x_p, wqkv, wout, bout, ln_g, ln_b, w1, b1, w2, b2, fin_g, fin_b)

    return out[:, :, :C]


# --------------------------------------------------------------------------
# Pure-JAX reference (for a sanity check)
# --------------------------------------------------------------------------
def _ln_ref(x, g, b):
    mu = jnp.mean(x, axis=-1, keepdims=True)
    var = jnp.mean((x - mu) ** 2, axis=-1, keepdims=True)
    return (x - mu) / jnp.sqrt(var + _EPS) * g + b


def reference_forward(x, layer_params, final_g, final_b, *, heads, head_dim):
    for p in layer_params:
        B, N, C = x.shape
        H = heads * head_dim
        qkv = x @ p["wqkv"]
        q, k, v = jnp.split(qkv, 3, axis=-1)

        def to_heads(t):
            return t.reshape(B, N, heads, head_dim).transpose(0, 2, 1, 3)

        q, k, v = map(to_heads, (q, k, v))
        dots = jnp.einsum("bhnd,bhmd->bhnm", q, k) * head_dim ** -0.5
        attn = jax.nn.softmax(dots, axis=-1)
        out = jnp.einsum("bhnm,bhmd->bhnd", attn, v)
        out = out.transpose(0, 2, 1, 3).reshape(B, N, H)
        x = out @ p["wout"] + p["bout"][0] + x
        xn = _ln_ref(x, p["ln_g"][0], p["ln_b"][0])
        h1 = xn @ p["w1"] + p["b1"][0]
        g = 0.5 * h1 * (1.0 + jax.lax.erf(h1 / jnp.sqrt(2.0)))
        x = g @ p["w2"] + p["b2"][0] + x
    return _ln_ref(x, final_g[0], final_b[0])


# --------------------------------------------------------------------------
# Main
# --------------------------------------------------------------------------
if __name__ == "__main__":
    # Small, module-consistent shapes.
    B, N = 2, 8               # batch, sequence length
    C = 32                    # in_channel
    heads, head_dim = 2, 16   # attention hidden = 32
    FF = 64                   # feed-forward hidden_dim
    depth = 2

    key = jax.random.PRNGKey(0)

    def nxt():
        global key
        key, sub = jax.random.split(key)
        return sub

    H = heads * head_dim

    # Shared feed-forward parameters (the PyTorch module reuses ONE
    # feed_forward instance across all depth layers).
    ff_shared = {
        "ln_g": jnp.ones((1, C), jnp.float32),
        "ln_b": jnp.zeros((1, C), jnp.float32),
        "w1": 0.05 * jax.random.normal(nxt(), (C, FF), jnp.float32),
        "b1": 0.05 * jax.random.normal(nxt(), (1, FF), jnp.float32),
        "w2": 0.05 * jax.random.normal(nxt(), (FF, C), jnp.float32),
        "b2": 0.05 * jax.random.normal(nxt(), (1, C), jnp.float32),
    }

    layer_params = []
    for _ in range(depth):
        p = {
            "wqkv": 0.05 * jax.random.normal(nxt(), (C, 3 * H), jnp.float32),
            "wout": 0.05 * jax.random.normal(nxt(), (H, C), jnp.float32),
            "bout": 0.05 * jax.random.normal(nxt(), (1, C), jnp.float32),
        }
        p.update(ff_shared)
        layer_params.append(p)

    final_g = jnp.ones((1, C), jnp.float32)
    final_b = jnp.zeros((1, C), jnp.float32)

    x = jax.random.normal(nxt(), (B, N, C), jnp.float32)

    out = transformer_forward(x, layer_params, final_g, final_b,
                              heads=heads, head_dim=head_dim)
    out = jax.block_until_ready(out)

    ref = reference_forward(x, layer_params, final_g, final_b,
                            heads=heads, head_dim=head_dim)
    assert out.shape == (B, N, C)
    max_err = float(jnp.max(jnp.abs(out - ref)))
    # bf16 MXU operands with f32 accumulation -> small tolerance vs f32 ref
    assert jnp.allclose(out, ref, atol=5e-2, rtol=5e-2), max_err

    print("KERNEL_OK")
</pallas_src>

<mosaic_0001>
module attributes {stable_mosaic.version = 11 : i64} {
  func.func @_fused_kernel(%arg0: i32, %arg1: i32, %arg2: memref<2x8x128xf32, #tpu.memory_space<vmem>>, %arg3: memref<1x128x768xbf16, #tpu.memory_space<vmem>>, %arg4: memref<1x2x128x128xbf16, #tpu.memory_space<vmem>>, %arg5: memref<1x1x128xf32, #tpu.memory_space<vmem>>, %arg6: memref<1x1x128xf32, #tpu.memory_space<vmem>>, %arg7: memref<1x1x128xf32, #tpu.memory_space<vmem>>, %arg8: memref<1x128x128xbf16, #tpu.memory_space<vmem>>, %arg9: memref<1x1x128xf32, #tpu.memory_space<vmem>>, %arg10: memref<1x128x128xbf16, #tpu.memory_space<vmem>>, %arg11: memref<1x1x128xf32, #tpu.memory_space<vmem>>, %arg12: memref<1x128xf32, #tpu.memory_space<vmem>>, %arg13: memref<1x128xf32, #tpu.memory_space<vmem>>, %arg14: memref<2x8x128xf32, #tpu.memory_space<vmem>>, %arg15: memref<2x8x128xf32, #tpu.memory_space<vmem>>) attributes {dimension_semantics = [#tpu.dimension_semantics<parallel>, #tpu.dimension_semantics<arbitrary>], iteration_bounds = array<i64: 1, 2>, scalar_prefetch = 0 : i64, scratch_operands = 1 : i64, tpu.core_type = #tpu.core_type<tc>, window_params = [{transform_indices = @transform_0, window_bounds = array<i64: 2, 8, 128>}, {transform_indices = @transform_1, window_bounds = array<i64: 1, 128, 768>}, {transform_indices = @transform_2, window_bounds = array<i64: 1, 2, 128, 128>}, {transform_indices = @transform_3, window_bounds = array<i64: 1, 1, 128>}, {transform_indices = @transform_4, window_bounds = array<i64: 1, 1, 128>}, {transform_indices = @transform_5, window_bounds = array<i64: 1, 1, 128>}, {transform_indices = @transform_6, window_bounds = array<i64: 1, 128, 128>}, {transform_indices = @transform_7, window_bounds = array<i64: 1, 1, 128>}, {transform_indices = @transform_8, window_bounds = array<i64: 1, 128, 128>}, {transform_indices = @transform_9, window_bounds = array<i64: 1, 1, 128>}, {pipeline_mode = #tpu.pipeline_mode<synchronous>, transform_indices = @transform_10, window_bounds = array<i64: 1, 128>}, {pipeline_mode = #tpu.pipeline_mode<synchronous>, transform_indices = @transform_11, window_bounds = array<i64: 1, 128>}, {transform_indices = @transform_12, window_bounds = array<i64: 2, 8, 128>}]} {
    %0 = tpu.iota {dimensions = array<i32: 1>} : vector<1x128xi32>
    %c32_i32 = arith.constant 32 : i32
    %1 = vector.broadcast %c32_i32 : i32 to vector<1x128xi32>
    %2 = arith.cmpi slt, %0, %1 : vector<1x128xi32>
    %3 = arith.extui %2 : vector<1x128xi1> to vector<1x128xi32>
    %4 = arith.sitofp %3 : vector<1x128xi32> to vector<1x128xf32>
    %c0_i32 = arith.constant 0 : i32
    %5 = arith.cmpi eq, %arg1, %c0_i32 : i32
    %6 = arith.extui %5 : i1 to i32
    %c0_i32_0 = arith.constant 0 : i32
    %7 = arith.cmpi ne, %6, %c0_i32_0 : i32
    scf.if %7 {
      %c0_59 = arith.constant 0 : index
      %c0_60 = arith.constant 0 : index
      %c0_61 = arith.constant 0 : index
      %133 = vector.load %arg2[%c0_59, %c0_60, %c0_61] : memref<2x8x128xf32, #tpu.memory_space<vmem>>, vector<2x8x128xf32>
      %c0_62 = arith.constant 0 : index
      %c0_63 = arith.constant 0 : index
      %c0_64 = arith.constant 0 : index
      %134 = vector.load %arg15[%c0_62, %c0_63, %c0_64] : memref<2x8x128xf32, #tpu.memory_space<vmem>>, vector<2x8x128xf32>
      tpu.vector_store %arg15[%c0_62, %c0_63, %c0_64], %133 {strides = array<i32>} : memref<2x8x128xf32, #tpu.memory_space<vmem>>, vector<2x8x128xf32>,
    } else {
    }
    %c0 = arith.constant 0 : index
    %c0_1 = arith.constant 0 : index
    %c0_2 = arith.constant 0 : index
    %8 = vector.load %arg15[%c0, %c0_1, %c0_2] : memref<2x8x128xf32, #tpu.memory_space<vmem>>, vector<2x8x128xf32>
    %9 = vector.shape_cast %8 : vector<2x8x128xf32> to vector<16x128xf32>
    %10 = arith.truncf %9 : vector<16x128xf32> to vector<16x128xbf16>
    %c0_3 = arith.constant 0 : index
    %c0_4 = arith.constant 0 : index
    %c0_5 = arith.constant 0 : index
    %11 = vector.load %arg3[%c0_3, %c0_4, %c0_5] : memref<1x128x768xbf16, #tpu.memory_space<vmem>>, vector<1x128x768xbf16>
    %12 = vector.shape_cast %11 : vector<1x128x768xbf16> to vector<128x768xbf16>
    %cst = arith.constant dense<0.000000e+00> : vector<16x768xf32>
    %13 = tpu.matmul %10, %12, %cst {dimension_numbers = #tpu.dot_dimension_numbers<[1], [0], [0], [1], [0, 0, 1, 1], [], []>} : vector<16x128xbf16>, vector<128x768xbf16>, vector<16x768xf32> -> vector<16x768xf32>
    %14 = vector.shape_cast %13 : vector<16x768xf32> to vector<2x8x768xf32>
    %c0_6 = arith.constant 0 : index
    %c0_7 = arith.constant 0 : index
    %c0_8 = arith.constant 0 : index
    %c0_9 = arith.constant 0 : index
    %15 = vector.load %arg4[%c0_6, %c0_7, %c0_8, %c0_9] : memref<1x2x128x128xbf16, #tpu.memory_space<vmem>>, vector<1x2x128x128xbf16>
    %16 = vector.shape_cast %15 : vector<1x2x128x128xbf16> to vector<2x128x128xbf16>
    %cst_10 = arith.constant 0.000000e+00 : f32
    %17 = vector.broadcast %cst_10 : f32 to vector<16x128xf32>
    %18 = vector.extract_strided_slice %14 {offsets = [0, 0, 0], sizes = [2, 8, 128], strides = [1, 1, 1]} : vector<2x8x768xf32> to vector<2x8x128xf32>
    %19 = arith.truncf %18 : vector<2x8x128xf32> to vector<2x8x128xbf16>
    %20 = vector.extract_strided_slice %14 {offsets = [0, 0, 256], sizes = [2, 8, 128], strides = [1, 1, 1]} : vector<2x8x768xf32> to vector<2x8x128xf32>
    %21 = arith.truncf %20 : vector<2x8x128xf32> to vector<2x8x128xbf16>
    %22 = vector.extract_strided_slice %14 {offsets = [0, 0, 512], sizes = [2, 8, 128], strides = [1, 1, 1]} : vector<2x8x768xf32> to vector<2x8x128xf32>
    %23 = arith.truncf %22 : vector<2x8x128xf32> to vector<2x8x128xbf16>
    "tpu.trace_start"() <{level = 10 : i32, message = "bnd,bmd->bnm"}> : () -> ()
    %cst_11 = arith.constant dense<0.000000e+00> : vector<2x8x8xf32>
    %24 = tpu.matmul %19, %21, %cst_11 {dimension_numbers = #tpu.dot_dimension_numbers<[2], [2], [1], [1], [0, 0, 0, 1, 1, 1], [0], [0]>} : vector<2x8x128xbf16>, vector<2x8x128xbf16>, vector<2x8x8xf32> -> vector<2x8x8xf32>
    "tpu.trace_stop"() : () -> ()
    %cst_12 = arith.constant 2.500000e-01 : f32
    %25 = vector.broadcast %cst_12 : f32 to vector<2x8x8xf32>
    %26 = arith.mulf %24, %25 : vector<2x8x8xf32>
    %cst_13 = arith.constant dense<0xFF800000> : vector<2x8xf32>
    %27 = vector.multi_reduction <maximumf>, %26, %cst_13 [2] : vector<2x8x8xf32> to vector<2x8xf32>
    %28 = vector.shape_cast %27 : vector<2x8xf32> to vector<2x8x1xf32>
    %29 = vector.broadcast %28 : vector<2x8x1xf32> to vector<2x8x8xf32>
    %30 = arith.subf %26, %29 : vector<2x8x8xf32>
    %31 = math.exp %30 : vector<2x8x8xf32>
    %cst_14 = arith.constant dense<0.000000e+00> : vector<2x8xf32>
    %32 = vector.multi_reduction <add>, %31, %cst_14 [2] : vector<2x8x8xf32> to vector<2x8xf32>
    %33 = vector.shape_cast %32 : vector<2x8xf32> to vector<2x8x1xf32>
    %34 = tpu.reciprocal %33 {approx = true} : vector<2x8x1xf32> -> vector<2x8x1xf32>
    %35 = vector.broadcast %34 : vector<2x8x1xf32> to vector<2x8x8xf32>
    %36 = arith.mulf %31, %35 : vector<2x8x8xf32>
    %37 = arith.truncf %36 : vector<2x8x8xf32> to vector<2x8x8xbf16>
    "tpu.trace_start"() <{level = 10 : i32, message = "bnm,bmd->bnd"}> : () -> ()
    %cst_15 = arith.constant dense<0.000000e+00> : vector<2x8x128xf32>
    %38 = tpu.matmul %37, %23, %cst_15 {dimension_numbers = #tpu.dot_dimension_numbers<[2], [1], [1], [2], [0, 0, 0, 1, 1, 2], [0], [0]>} : vector<2x8x8xbf16>, vector<2x8x128xbf16>, vector<2x8x128xf32> -> vector<2x8x128xf32>
    "tpu.trace_stop"() : () -> ()
    %39 = vector.shape_cast %38 : vector<2x8x128xf32> to vector<16x128xf32>
    %40 = arith.truncf %39 : vector<16x128xf32> to vector<16x128xbf16>
    %41 = vector.extract_strided_slice %16 {offsets = [0, 0, 0], sizes = [1, 128, 128], strides = [1, 1, 1]} : vector<2x128x128xbf16> to vector<1x128x128xbf16>
    %42 = vector.shape_cast %41 : vector<1x128x128xbf16> to vector<128x128xbf16>
    %cst_16 = arith.constant dense<0.000000e+00> : vector<16x128xf32>
    %43 = tpu.matmul %40, %42, %cst_16 {dimension_numbers = #tpu.dot_dimension_numbers<[1], [0], [0], [1], [0, 0, 1, 1], [], []>} : vector<16x128xbf16>, vector<128x128xbf16>, vector<16x128xf32> -> vector<16x128xf32>
    %44 = arith.addf %17, %43 : vector<16x128xf32>
    %45 = vector.extract_strided_slice %14 {offsets = [0, 0, 128], sizes = [2, 8, 128], strides = [1, 1, 1]} : vector<2x8x768xf32> to vector<2x8x128xf32>
    %46 = arith.truncf %45 : vector<2x8x128xf32> to vector<2x8x128xbf16>
    %47 = vector.extract_strided_slice %14 {offsets = [0, 0, 384], sizes = [2, 8, 128], strides = [1, 1, 1]} : vector<2x8x768xf32> to vector<2x8x128xf32>
    %48 = arith.truncf %47 : vector<2x8x128xf32> to vector<2x8x128xbf16>
    %49 = vector.extract_strided_slice %14 {offsets = [0, 0, 640], sizes = [2, 8, 128], strides = [1, 1, 1]} : vector<2x8x768xf32> to vector<2x8x128xf32>
    %50 = arith.truncf %49 : vector<2x8x128xf32> to vector<2x8x128xbf16>
    "tpu.trace_start"() <{level = 10 : i32, message = "bnd,bmd->bnm"}> : () -> ()
    %cst_17 = arith.constant dense<0.000000e+00> : vector<2x8x8xf32>
    %51 = tpu.matmul %46, %48, %cst_17 {dimension_numbers = #tpu.dot_dimension_numbers<[2], [2], [1], [1], [0, 0, 0, 1, 1, 1], [0], [0]>} : vector<2x8x128xbf16>, vector<2x8x128xbf16>, vector<2x8x8xf32> -> vector<2x8x8xf32>
    "tpu.trace_stop"() : () -> ()
    %cst_18 = arith.constant 2.500000e-01 : f32
    %52 = vector.broadcast %cst_18 : f32 to vector<2x8x8xf32>
    %53 = arith.mulf %51, %52 : vector<2x8x8xf32>
    %cst_19 = arith.constant dense<0xFF800000> : vector<2x8xf32>
    %54 = vector.multi_reduction <maximumf>, %53, %cst_19 [2] : vector<2x8x8xf32> to vector<2x8xf32>
    %55 = vector.shape_cast %54 : vector<2x8xf32> to vector<2x8x1xf32>
    %56 = vector.broadcast %55 : vector<2x8x1xf32> to vector<2x8x8xf32>
    %57 = arith.subf %53, %56 : vector<2x8x8xf32>
    %58 = math.exp %57 : vector<2x8x8xf32>
    %cst_20 = arith.constant dense<0.000000e+00> : vector<2x8xf32>
    %59 = vector.multi_reduction <add>, %58, %cst_20 [2] : vector<2x8x8xf32> to vector<2x8xf32>
    %60 = vector.shape_cast %59 : vector<2x8xf32> to vector<2x8x1xf32>
    %61 = tpu.reciprocal %60 {approx = true} : vector<2x8x1xf32> -> vector<2x8x1xf32>
    %62 = vector.broadcast %61 : vector<2x8x1xf32> to vector<2x8x8xf32>
    %63 = arith.mulf %58, %62 : vector<2x8x8xf32>
    %64 = arith.truncf %63 : vector<2x8x8xf32> to vector<2x8x8xbf16>
    "tpu.trace_start"() <{level = 10 : i32, message = "bnm,bmd->bnd"}> : () -> ()
    %cst_21 = arith.constant dense<0.000000e+00> : vector<2x8x128xf32>
    %65 = tpu.matmul %64, %50, %cst_21 {dimension_numbers = #tpu.dot_dimension_numbers<[2], [1], [1], [2], [0, 0, 0, 1, 1, 2], [0], [0]>} : vector<2x8x8xbf16>, vector<2x8x128xbf16>, vector<2x8x128xf32> -> vector<2x8x128xf32>
    "tpu.trace_stop"() : () -> ()
    %66 = vector.shape_cast %65 : vector<2x8x128xf32> to vector<16x128xf32>
    %67 = arith.truncf %66 : vector<16x128xf32> to vector<16x128xbf16>
    %68 = vector.extract_strided_slice %16 {offsets = [1, 0, 0], sizes = [1, 128, 128], strides = [1, 1, 1]} : vector<2x128x128xbf16> to vector<1x128x128xbf16>
    %69 = vector.shape_cast %68 : vector<1x128x128xbf16> to vector<128x128xbf16>
    %cst_22 = arith.constant dense<0.000000e+00> : vector<16x128xf32>
    %70 = tpu.matmul %67, %69, %cst_22 {dimension_numbers = #tpu.dot_dimension_numbers<[1], [0], [0], [1], [0, 0, 1, 1], [], []>} : vector<16x128xbf16>, vector<128x128xbf16>, vector<16x128xf32> -> vector<16x128xf32>
    %71 = arith.addf %44, %70 : vector<16x128xf32>
    %c0_23 = arith.constant 0 : index
    %c0_24 = arith.constant 0 : index
    %c0_25 = arith.constant 0 : index
    %72 = vector.load %arg5[%c0_23, %c0_24, %c0_25] : memref<1x1x128xf32, #tpu.memory_space<vmem>>, vector<1x1x128xf32>
    %73 = vector.shape_cast %72 : vector<1x1x128xf32> to vector<1x128xf32>
    %74 = vector.broadcast %73 : vector<1x128xf32> to vector<16x128xf32>
    %75 = arith.addf %71, %74 : vector<16x128xf32>
    %76 = arith.addf %75, %9 : vector<16x128xf32>
    %cst_26 = arith.constant dense<0.000000e+00> : vector<16xf32>
    %77 = vector.multi_reduction <add>, %76, %cst_26 [1] : vector<16x128xf32> to vector<16xf32>
    %78 = vector.shape_cast %77 : vector<16xf32> to vector<16x1xf32>
    %cst_27 = arith.constant 3.125000e-02 : f32
    %79 = vector.broadcast %cst_27 : f32 to vector<16x1xf32>
    %80 = arith.mulf %78, %79 : vector<16x1xf32>
    %81 = vector.broadcast %80 : vector<16x1xf32> to vector<16x128xf32>
    %82 = arith.subf %76, %81 : vector<16x128xf32>
    %83 = vector.broadcast %4 : vector<1x128xf32> to vector<16x128xf32>
    %84 = arith.mulf %82, %83 : vector<16x128xf32>
    %85 = arith.mulf %84, %84 : vector<16x128xf32>
    %cst_28 = arith.constant dense<0.000000e+00> : vector<16xf32>
    %86 = vector.multi_reduction <add>, %85, %cst_28 [1] : vector<16x128xf32> to vector<16xf32>
    %87 = vector.shape_cast %86 : vector<16xf32> to vector<16x1xf32>
    %cst_29 = arith.constant 3.125000e-02 : f32
    %88 = vector.broadcast %cst_29 : f32 to vector<16x1xf32>
    %89 = arith.mulf %87, %88 : vector<16x1xf32>
    %cst_30 = arith.constant 9.99999974E-6 : f32
    %90 = vector.broadcast %cst_30 : f32 to vector<16x1xf32>
    %91 = arith.addf %89, %90 : vector<16x1xf32>
    %92 = math.rsqrt %91 : vector<16x1xf32>
    %93 = vector.broadcast %92 : vector<16x1xf32> to vector<16x128xf32>
    %94 = arith.mulf %84, %93 : vector<16x128xf32>
    %c0_31 = arith.constant 0 : index
    %c0_32 = arith.constant 0 : index
    %c0_33 = arith.constant 0 : index
    %95 = vector.load %arg6[%c0_31, %c0_32, %c0_33] : memref<1x1x128xf32, #tpu.memory_space<vmem>>, vector<1x1x128xf32>
    %96 = vector.shape_cast %95 : vector<1x1x128xf32> to vector<1x128xf32>
    %97 = vector.broadcast %96 : vector<1x128xf32> to vector<16x128xf32>
    %98 = arith.mulf %94, %97 : vector<16x128xf32>
    %c0_34 = arith.constant 0 : index
    %c0_35 = arith.constant 0 : index
    %c0_36 = arith.constant 0 : index
    %99 = vector.load %arg7[%c0_34, %c0_35, %c0_36] : memref<1x1x128xf32, #tpu.memory_space<vmem>>, vector<1x1x128xf32>
    %100 = vector.shape_cast %99 : vector<1x1x128xf32> to vector<1x128xf32>
    %101 = vector.broadcast %100 : vector<1x128xf32> to vector<16x128xf32>
    %102 = arith.addf %98, %101 : vector<16x128xf32>
    %103 = arith.truncf %102 : vector<16x128xf32> to vector<16x128xbf16>
    %c0_37 = arith.constant 0 : index
    %c0_38 = arith.constant 0 : index
    %c0_39 = arith.constant 0 : index
    %104 = vector.load %arg8[%c0_37, %c0_38, %c0_39] : memref<1x128x128xbf16, #tpu.memory_space<vmem>>, vector<1x128x128xbf16>
    %105 = vector.shape_cast %104 : vector<1x128x128xbf16> to vector<128x128xbf16>
    %cst_40 = arith.constant dense<0.000000e+00> : vector<16x128xf32>
    %106 = tpu.matmul %103, %105, %cst_40 {dimension_numbers = #tpu.dot_dimension_numbers<[1], [0], [0], [1], [0, 0, 1, 1], [], []>} : vector<16x128xbf16>, vector<128x128xbf16>, vector<16x128xf32> -> vector<16x128xf32>
    %c0_41 = arith.constant 0 : index
    %c0_42 = arith.constant 0 : index
    %c0_43 = arith.constant 0 : index
    %107 = vector.load %arg9[%c0_41, %c0_42, %c0_43] : memref<1x1x128xf32, #tpu.memory_space<vmem>>, vector<1x1x128xf32>
    %108 = vector.shape_cast %107 : vector<1x1x128xf32> to vector<1x128xf32>
    %109 = vector.broadcast %108 : vector<1x128xf32> to vector<16x128xf32>
    %110 = arith.addf %106, %109 : vector<16x128xf32>
    %cst_44 = arith.constant 5.000000e-01 : f32
    %111 = vector.broadcast %cst_44 : f32 to vector<16x128xf32>
    %112 = arith.mulf %111, %110 : vector<16x128xf32>
    %cst_45 = arith.constant 0.707106769 : f32
    %113 = vector.broadcast %cst_45 : f32 to vector<16x128xf32>
    %114 = arith.mulf %110, %113 : vector<16x128xf32>
    %115 = math.erf %114 : vector<16x128xf32>
    %cst_46 = arith.constant 1.000000e+00 : f32
    %116 = vector.broadcast %cst_46 : f32 to vector<16x128xf32>
    %117 = arith.addf %116, %115 : vector<16x128xf32>
    %118 = arith.mulf %112, %117 : vector<16x128xf32>
    %119 = arith.truncf %118 : vector<16x128xf32> to vector<16x128xbf16>
    %c0_47 = arith.constant 0 : index
    %c0_48 = arith.constant 0 : index
    %c0_49 = arith.constant 0 : index
    %120 = vector.load %arg10[%c0_47, %c0_48, %c0_49] : memref<1x128x128xbf16, #tpu.memory_space<vmem>>, vector<1x128x128xbf16>
    %121 = vector.shape_cast %120 : vector<1x128x128xbf16> to vector<128x128xbf16>
    %cst_50 = arith.constant dense<0.000000e+00> : vector<16x128xf32>
    %122 = tpu.matmul %119, %121, %cst_50 {dimension_numbers = #tpu.dot_dimension_numbers<[1], [0], [0], [1], [0, 0, 1, 1], [], []>} : vector<16x128xbf16>, vector<128x128xbf16>, vector<16x128xf32> -> vector<16x128xf32>
    %c0_51 = arith.constant 0 : index
    %c0_52 = arith.constant 0 : index
    %c0_53 = arith.constant 0 : index
    %123 = vector.load %arg11[%c0_51, %c0_52, %c0_53] : memref<1x1x128xf32, #tpu.memory_space<vmem>>, vector<1x1x128xf32>
    %124 = vector.shape_cast %123 : vector<1x1x128xf32> to vector<1x128xf32>
    %125 = vector.broadcast %124 : vector<1x128xf32> to vector<16x128xf32>
    %126 = arith.addf %122, %125 : vector<16x128xf32>
    %127 = arith.addf %126, %76 : vector<16x128xf32>
    %128 = vector.shape_cast %127 : vector<16x128xf32> to vector<2x8x128xf32>
    %c0_54 = arith.constant 0 : index
    %c0_55 = arith.constant 0 : index
    %c0_56 = arith.constant 0 : index
    %129 = vector.load %arg15[%c0_54, %c0_55, %c0_56] : memref<2x8x128xf32, #tpu.memory_space<vmem>>, vector<2x8x128xf32>
    tpu.vector_store %arg15[%c0_54, %c0_55, %c0_56], %128 {strides = array<i32>} : memref<2x8x128xf32, #tpu.memory_space<vmem>>, vector<2x8x128xf32>,
    %c1_i32 = arith.constant 1 : i32
    %130 = arith.cmpi eq, %arg1, %c1_i32 : i32
    %131 = arith.extui %130 : i1 to i32
    %cst_57 = arith.constant 3.125000e-02 : f32
    %c0_i32_58 = arith.constant 0 : i32
    %132 = arith.cmpi ne, %131, %c0_i32_58 : i32
    scf.if %132 {
      %cst_59 = arith.constant dense<0.000000e+00> : vector<16xf32>
      %133 = vector.multi_reduction <add>, %127, %cst_59 [1] : vector<16x128xf32> to vector<16xf32>
      %134 = vector.shape_cast %133 : vector<16xf32> to vector<16x1xf32>
      %135 = vector.broadcast %cst_57 : f32 to vector<16x1xf32>
      %136 = arith.mulf %134, %135 : vector<16x1xf32>
      %137 = vector.broadcast %136 : vector<16x1xf32> to vector<16x128xf32>
      %138 = arith.subf %127, %137 : vector<16x128xf32>
      %139 = vector.broadcast %4 : vector<1x128xf32> to vector<16x128xf32>
      %140 = arith.mulf %138, %139 : vector<16x128xf32>
      %141 = arith.mulf %140, %140 : vector<16x128xf32>
      %cst_60 = arith.constant dense<0.000000e+00> : vector<16xf32>
      %142 = vector.multi_reduction <add>, %141, %cst_60 [1] : vector<16x128xf32> to vector<16xf32>
      %143 = vector.shape_cast %142 : vector<16xf32> to vector<16x1xf32>
      %144 = vector.broadcast %cst_57 : f32 to vector<16x1xf32>
      %145 = arith.mulf %143, %144 : vector<16x1xf32>
      %cst_61 = arith.constant 9.99999974E-6 : f32
      %146 = vector.broadcast %cst_61 : f32 to vector<16x1xf32>
      %147 = arith.addf %145, %146 : vector<16x1xf32>
      %148 = math.rsqrt %147 : vector<16x1xf32>
      %149 = vector.broadcast %148 : vector<16x1xf32> to vector<16x128xf32>
      %150 = arith.mulf %140, %149 : vector<16x128xf32>
      %c0_62 = arith.constant 0 : index
      %c0_63 = arith.constant 0 : index
      %151 = vector.load %arg12[%c0_62, %c0_63] : memref<1x128xf32, #tpu.memory_space<vmem>>, vector<1x128xf32>
      %152 = vector.broadcast %151 : vector<1x128xf32> to vector<16x128xf32>
      %153 = arith.mulf %150, %152 : vector<16x128xf32>
      %c0_64 = arith.constant 0 : index
      %c0_65 = arith.constant 0 : index
      %154 = vector.load %arg13[%c0_64, %c0_65] : memref<1x128xf32, #tpu.memory_space<vmem>>, vector<1x128xf32>
      %155 = vector.broadcast %154 : vector<1x128xf32> to vector<16x128xf32>
      %156 = arith.addf %153, %155 : vector<16x128xf32>
      %157 = vector.shape_cast %156 : vector<16x128xf32> to vector<2x8x128xf32>
      %c0_66 = arith.constant 0 : index
      %c0_67 = arith.constant 0 : index
      %c0_68 = arith.constant 0 : index
      %158 = vector.load %arg14[%c0_66, %c0_67, %c0_68] : memref<2x8x128xf32, #tpu.memory_space<vmem>>, vector<2x8x128xf32>
      tpu.vector_store %arg14[%c0_66, %c0_67, %c0_68], %157 {strides = array<i32>} : memref<2x8x128xf32, #tpu.memory_space<vmem>>, vector<2x8x128xf32>,
    } else {
    }
    return
  }
  func.func @transform_0(%arg0: i32, %arg1: i32) -> (i32, i32, i32) {
    %c0_i32 = arith.constant 0 : i32
    %c0_i32_0 = arith.constant 0 : i32
    %c0_i32_1 = arith.constant 0 : i32
    return %arg0, %c0_i32, %c0_i32_0 : i32, i32, i32
  }
  func.func @transform_1(%arg0: i32, %arg1: i32) -> (i32, i32, i32) {
    %c0_i32 = arith.constant 0 : i32
    %c0_i32_0 = arith.constant 0 : i32
    %c0_i32_1 = arith.constant 0 : i32
    return %arg1, %c0_i32, %c0_i32_0 : i32, i32, i32
  }
  func.func @transform_2(%arg0: i32, %arg1: i32) -> (i32, i32, i32, i32) {
    %c0_i32 = arith.constant 0 : i32
    %c0_i32_0 = arith.constant 0 : i32
    %c0_i32_1 = arith.constant 0 : i32
    %c0_i32_2 = arith.constant 0 : i32
    return %arg1, %c0_i32, %c0_i32_0, %c0_i32_1 : i32, i32, i32, i32
  }
  func.func @transform_3(%arg0: i32, %arg1: i32) -> (i32, i32, i32) {
    %c0_i32 = arith.constant 0 : i32
    %c0_i32_0 = arith.constant 0 : i32
    %c0_i32_1 = arith.constant 0 : i32
    return %arg1, %c0_i32, %c0_i32_0 : i32, i32, i32
  }
  func.func @transform_4(%arg0: i32, %arg1: i32) -> (i32, i32, i32) {
    %c0_i32 = arith.constant 0 : i32
    %c0_i32_0 = arith.constant 0 : i32
    %c0_i32_1 = arith.constant 0 : i32
    return %arg1, %c0_i32, %c0_i32_0 : i32, i32, i32
  }
  func.func @transform_5(%arg0: i32, %arg1: i32) -> (i32, i32, i32) {
    %c0_i32 = arith.constant 0 : i32
    %c0_i32_0 = arith.constant 0 : i32
    %c0_i32_1 = arith.constant 0 : i32
    return %arg1, %c0_i32, %c0_i32_0 : i32, i32, i32
  }
  func.func @transform_6(%arg0: i32, %arg1: i32) -> (i32, i32, i32) {
    %c0_i32 = arith.constant 0 : i32
    %c0_i32_0 = arith.constant 0 : i32
    %c0_i32_1 = arith.constant 0 : i32
    return %arg1, %c0_i32, %c0_i32_0 : i32, i32, i32
  }
  func.func @transform_7(%arg0: i32, %arg1: i32) -> (i32, i32, i32) {
    %c0_i32 = arith.constant 0 : i32
    %c0_i32_0 = arith.constant 0 : i32
    %c0_i32_1 = arith.constant 0 : i32
    return %arg1, %c0_i32, %c0_i32_0 : i32, i32, i32
  }
  func.func @transform_8(%arg0: i32, %arg1: i32) -> (i32, i32, i32) {
    %c0_i32 = arith.constant 0 : i32
    %c0_i32_0 = arith.constant 0 : i32
    %c0_i32_1 = arith.constant 0 : i32
    return %arg1, %c0_i32, %c0_i32_0 : i32, i32, i32
  }
  func.func @transform_9(%arg0: i32, %arg1: i32) -> (i32, i32, i32) {
    %c0_i32 = arith.constant 0 : i32
    %c0_i32_0 = arith.constant 0 : i32
    %c0_i32_1 = arith.constant 0 : i32
    return %arg1, %c0_i32, %c0_i32_0 : i32, i32, i32
  }
  func.func @transform_10(%arg0: i32, %arg1: i32) -> (i32, i32) {
    %c0_i32 = arith.constant 0 : i32
    %c0_i32_0 = arith.constant 0 : i32
    %c0_i32_1 = arith.constant 0 : i32
    return %c0_i32, %c0_i32_0 : i32, i32
  }
  func.func @transform_11(%arg0: i32, %arg1: i32) -> (i32, i32) {
    %c0_i32 = arith.constant 0 : i32
    %c0_i32_0 = arith.constant 0 : i32
    %c0_i32_1 = arith.constant 0 : i32
    return %c0_i32, %c0_i32_0 : i32, i32
  }
  func.func @transform_12(%arg0: i32, %arg1: i32) -> (i32, i32, i32) {
    %c0_i32 = arith.constant 0 : i32
    %c0_i32_0 = arith.constant 0 : i32
    %c0_i32_1 = arith.constant 0 : i32
    return %arg0, %c0_i32, %c0_i32_0 : i32, i32, i32
  }
}

</mosaic_0001>

<bundles_post_ra>
// kernel: tpu_custom_call.1
= control target key start
LH: loop header
LB: loop body
LE: loop exit
PB: predicated region body
PF: predicated region fallthrough
CT: control target
= control target key end

     0   :  { %s3566_s0 = inlined_call_operand.hbm [shape: f32[2,8,128], index: 0, kind: input, shape index: {}]   ;;  %s3567_s1 = inlined_call_operand.hbm [shape: bf16[2,128,768], index: 1, kind: input, shape index: {}]   ;;  %s3568_s2 = inlined_call_operand.hbm [shape: bf16[2,2,128,128], index: 2, kind: input, shape index: {}]   ;;  %s3569_s3 = inlined_call_operand.vmem [shape: f32[2,1,128], index: 3, kind: input, shape index: {}]   ;;  %s3570_s4 = inlined_call_operand.vmem [shape: f32[2,1,128], index: 4, kind: input, shape index: {}]   ;;  %s3571_s5 = inlined_call_operand.vmem [shape: f32[2,1,128], index: 5, kind: input, shape index: {}]   ;;  %s3572_s6 = inlined_call_operand.hbm [shape: bf16[2,128,128], index: 6, kind: input, shape index: {}]   ;;  %s3573_s7 = inlined_call_operand.vmem [shape: f32[2,1,128], index: 7, kind: input, shape index: {}]   ;;  %s3574_s8 = inlined_call_operand.hbm [shape: bf16[2,128,128], index: 8, kind: input, shape index: {}]   ;;  %s3575_s9 = inlined_call_operand.vmem [shape: f32[2,1,128], index: 9, kind: input, shape index: {}]   ;;  %s3576_s10 = inlined_call_operand.vmem [shape: f32[1,128], index: 10, kind: input, shape index: {}]   ;;  %s3577_s11 = inlined_call_operand.vmem [shape: f32[1,128], index: 11, kind: input, shape index: {}]   ;;  %s3578_s12 = inlined_call_operand.hbm [shape: f32[2,8,128], index: 12, kind: output, shape index: {}]  }
   0x1   :  { %3583 = sst [smem:[#allocation20_spill]] %s3566_s0 }
   0x2   :  { %3584 = sst [smem:[#allocation21_spill]] %s3567_s1 }
   0x3   :  { %3585 = sst [smem:[#allocation22_spill]] %s3571_s5 }
   0x4   :  { %3586 = sst [smem:[#allocation23_spill]] %s3573_s7 }
   0x5   :  { %3587 = sst [smem:[#allocation24_spill]] %s3575_s9 }
   0x6   :  { %3588 = sst [smem:[#allocation25_spill]] %s3576_s10 }
   0x7   :  { %3589 = sst [smem:[#allocation26_spill]] %s3577_s11 }
   0x8   :  { %3590 = sst [smem:[#allocation27_spill]] %s3578_s12 }
   0x9   :  { %17 = vsyncpa [#allocation4], 0 }
   0xa   :  { %18 = vsyncpa [#allocation7], 0 }
   0xb   :  { %20 = vsyncpa [#allocation7 + $0x1], 0 }
   0xc   :  { %21 = vsyncpa [#allocation10], 0 }
   0xd   :  { %23 = vsyncpa [#allocation10 + $0x1], 0 }
   0xe   :  { %24 = vsyncpa [#allocation5], 0  ;;  %s3080_s21 = smov 0   ;;  %s3082_s22 = smov 0  }
   0xf   :  { %s3084_s23 = smov 0   ;;  %s3086_s24 = smov 0  }
  0x10   :  { %s3088_s25 = smov 0   ;;  %s3090_s26 = smov 0  }
  0x11 LB: > { %3591 = sst [smem:[#allocation17_spill]] %s2984_s23  ;;  %s39_s27 = sadd.s32 1, %s2992_s25  ;;  %s2996_s26 = sphi %s3090_s26, %s30_s26   ;;  %s2992_s25 = sphi %s3088_s25, %s3619_s25   ;;  %s2988_s24 = sphi %s3086_s24, %s3618_s24   ;;  %s2984_s23 = sphi %s3084_s23, %s3614_s23   ;;  %s2980_s22 = sphi %s3082_s22, %s3617_s22   ;;  %s2976_s21 = sphi %s3080_s21, %s3616_s21  }
  0x12   : > { %s75_s28 = sadd.s32 1, %s2984_s23  ;;  %p40_p0 = scmp.ge.s32.totalorder %s39_s27, 2 }
  0x13   : > { %p82_p1 = scmp.ne.s32.totalorder %s2984_s23, %s2980_s22  ;;  %p83_p2 = scmp.eq.s32.totalorder %s2996_s26, 0 }
  0x14   : > { %s3621_s27 = smov (%p40_p0, %s39_s27), 0  ;;  %p2575_p4 = scmp.lt.s32.totalorder %s2996_s26, 2 }
  0x15   : > { %3592 = sst [smem:[#allocation18_spill]] %s3621_s27  ;;  %p84_p3 = por %p83_p2, %p82_p1 }
  0x16   : > { %s72_s29 = ssub.s32 %s2992_s25, %s3621_s27  ;;  %s3122_s13 = sand.u32 1, %s2984_s23  }
  0x17   : > { %p73_p5 = scmp.eq.s32.totalorder %s72_s29, 0  ;;  %s2539_s14 = smul.u32 6144, %s2992_s25 }
  0x18   : > { %s2538_s16 = smul.u32 384, %s3122_s13  ;;  %s3594_s1 = sld [smem:[#allocation21_spill]] }
  0x19   : > { %s3126_s15 = scalar_select %p73_p5, %s2984_s23, %s75_s28  }
  0x1a   : > { %p3132_p6 = pnand %p2575_p4, %p84_p3  ;;  %s414_s27 = scalar_lea.vmem [#allocation6], %s2538_s16 }
  0x1b   : > { %3593 = sst [smem:[#allocation19_spill]] %s3126_s15  ;;  %s421_s30 = sshll.u32 %s414_s27, 4  ;;  %s422_s30 = int_to_ptr.vmem [resolvable:$true] %s421_s30 }
  0x1c   : > { %s3596_s29 = sand.u32 1, %s2996_s26   ;;  %p2774_p7 = pneg %p3132_p6 }
  0x1d   : > { %s3138_s12 = scalar_lea.sflag [#allocation7], %s3596_s29  ;;  %s2785_s28 = scalar_lea.vmem %s422_s30, 6144 }
  0x1e   : > { %s420_s19 = scalar_lea.hbm %s3594_s1, %s2539_s14  ;;  %p2786_p8 = scmp.ne.s32.totalorder %s422_s30, %s2785_s28 }
  0x1f   : > { %s2998_s14 = smov [#allocation6]  }
  0x20   : > { %p2788_p9 = pnand %p2786_p8, %p2774_p7  ;;  %s2790_s17 = sshll.u32 %s2998_s14, 4  ;;  %s2791_s17 = int_to_ptr.vmem [resolvable:$false] %s2790_s17 }
  0x21   : > { %s2792_s18 = scalar_lea.vmem %s2791_s17, 12288  ;;  %p2793_p11 = scmp.lt.s32.totalorder %s422_s30, %s2791_s17 }
  0x22   : > { %p2789_p10 = pneg %p2788_p9  ;;  %p2794_p12 = scmp.lt.s32.totalorder %s2792_s18, %s2785_s28 }
  0x24   : > { %p2795_p13 = por %p2794_p12, %p2793_p11 }
  0x26   : > { %p2796_p0 = pnand %p2795_p13, %p2789_p10 }
  0x28   : > { %2799 = shalt.err (!%p2796_p0)
}
  0x29   : > { %s2999_s27 = smov 384   ;;  %s3000_s16 = smov 24  }
  0x2a   : > { %2564 = dma.hbm_to_vmem [thread:$0]  (!%p3132_p6), %s420_s19, 6144, %s422_s30, %s3138_s12, %s2999_s27, %s2999_s27, %s3000_s16  }
  0x2b   : > { %s2246_s29 = sshll.u32 %s3122_s13, 6  ;;  %s2356_s1 = sshll.u32 %s2992_s25, 10 }
  0x2c   : > { %s480_s17 = scalar_lea.hbm %s3572_s6, %s2356_s1  ;;  %s474_s28 = scalar_lea.vmem [#allocation9], %s2246_s29 }
  0x2d   : > { %s481_s18 = sshll.u32 %s474_s28, 4  ;;  %s3156_s10 = scalar_lea.hbm %s3574_s8, %s2356_s1  ;;  %s482_s18 = int_to_ptr.vmem [resolvable:$true] %s481_s18 }
  0x2e   : > { %s3597_s9 = sand.u32 1, %s2996_s26   ;;  %s2813_s5 = scalar_lea.vmem %s482_s18, 1024 }
  0x2f   : > { %s3160_s7 = scalar_lea.sflag [#allocation10], %s3597_s9  ;;  %p2814_p1 = scmp.ne.s32.totalorder %s482_s18, %s2813_s5 }
  0x30   : > { %s3001_s30 = smov [#allocation9]  }
  0x31   : > { %p2816_p2 = pnand %p2814_p1, %p2774_p7  ;;  %s2818_s15 = sshll.u32 %s3001_s30, 4  ;;  %s2819_s15 = int_to_ptr.vmem [resolvable:$false] %s2818_s15 }
  0x32   : > { %s2820_s19 = scalar_lea.vmem %s2819_s15, 2048  ;;  %p2821_p4 = scmp.lt.s32.totalorder %s482_s18, %s2819_s15 }
  0x33   : > { %p2817_p3 = pneg %p2816_p2  ;;  %p2822_p5 = scmp.lt.s32.totalorder %s2820_s19, %s2813_s5 }
  0x35   : > { %p2823_p8 = por %p2822_p5, %p2821_p4 }
  0x37   : > { %p2824_p9 = pnand %p2823_p8, %p2817_p3 }
  0x39   : > { %2827 = shalt.err (!%p2824_p9)
}
  0x3a   : > { %s3581_s1 = smov 64   ;;  %s3003_s9 = smov 4  }
  0x3b   : > { %2570 = dma.hbm_to_vmem [thread:$0]  (!%p3132_p6), %s480_s17, 1024, %s482_s18, %s3160_s7, %s3581_s1, %s3581_s1, %s3003_s9  }
  0x3c   : > { %s501_s5 = scalar_lea.vmem [#allocation11], %s2246_s29  ;;  %s3174_s23 = sadd.s32 4294967295, %s2996_s26  }
  0x3d   : > { %s508_s11 = sshll.u32 %s501_s5, 4  ;;  %p88_p10 = scmp.ne.s32.totalorder %s2980_s22, %s2976_s21  ;;  %s3171_s11 = int_to_ptr.vmem [resolvable:$true] %s508_s11 }
  0x3e   : > { %p89_p11 = scmp.eq.s32.totalorder %s3174_s23, 0  ;;  %p2239_p12 = scmp.ge.s32.totalorder %s2996_s26, 1 }
  0x3f   : > { %p375_p13 = scmp.lt.s32.totalorder %s2996_s26, 3  ;;  %s3004_s29 = smov [#allocation3]  }
  0x40   : > { %p3183_p0 = por %p89_p11, %p88_p10  ;;  %s390_s14 = sshll.u32 %s3004_s29, 4  ;;  %s391_s14 = int_to_ptr.vmem [resolvable:$true] %s390_s14 }
  0x41   : > { %p3187_p1 = pnand %p2239_p12, %p375_p13  ;;  %s2243_s17 = sshll.u32 %s3122_s13, 7 }
  0x42   : > { %s2355_s21 = sshll.u32 %s2992_s25, 11  ;;  %s435_s19 = scalar_lea.vmem [#allocation8], %s2243_s17 }
  0x43   : > { %p2557_p2 = pneg %p3187_p1  ;;  %s3204_s15 = scalar_lea.hbm %s3568_s2, %s2355_s21 }
  0x44   : > { %s442_s5 = sshll.u32 %s435_s19, 4  ;;  %s2839_s29 = scalar_lea.vmem %s391_s14, 256  ;;  %s3206_s5 = int_to_ptr.vmem [resolvable:$true] %s442_s5 }
  0x45   : > { %p3197_p3 = pnand %p2557_p2, %p89_p11  ;;  %p2840_p5 = scmp.ne.s32.totalorder %s391_s14, %s2839_s29 }
  0x46   : > { %p2847_p10 = scmp.lt.s32.totalorder %s391_s14, %s391_s14  ;;  %p2848_p12 = scmp.lt.s32.totalorder %s2839_s29, %s2839_s29 }
  0x47   : > { %p2830_p4 = pneg %p3197_p3 }
  0x48   : > { %p2849_p13 = por %p2848_p12, %p2847_p10 }
  0x49   : > { %p2842_p8 = pnand %p2840_p5, %p2830_p4 }
  0x4b   : > { %p2843_p9 = pneg %p2842_p8 }
  0x4d   : > { %p2850_p2 = pnand %p2849_p13, %p2843_p9 }
  0x4f   : > { %2853 = shalt.err (!%p2850_p2)
}
  0x50   : > { %s3005_s13 = smov 128   ;;  %s3006_s17 = smov 8  }
  0x51   : > { %s3601_s0 = sld [smem:[#allocation20_spill]]  ;;  %s2867_s30 = scalar_lea.vmem %s3206_s5, 2048 }
  0x52   : > { %p2868_p4 = scmp.ne.s32.totalorder %s3206_s5, %s2867_s30  ;;  %s3007_s19 = smov [#allocation8]  }
  0x53   : > { %s2872_s29 = sshll.u32 %s3007_s19, 4  ;;  %s2873_s29 = int_to_ptr.vmem [resolvable:$false] %s2872_s29 }
  0x54   : > { %p2870_p5 = pnand %p2868_p4, %p2774_p7  ;;  %s2874_s1 = scalar_lea.vmem %s2873_s29, 4096 }
  0x55   : > { %p2875_p9 = scmp.lt.s32.totalorder %s3206_s5, %s2873_s29  ;;  %p2876_p10 = scmp.lt.s32.totalorder %s2874_s1, %s2867_s30 }
  0x56   : > { %p2871_p8 = pneg %p2870_p5 }
  0x57   : > { %2560 = dma.hbm_to_vmem [thread:$0]  (!%p3197_p3), %s3601_s0, 256, %s391_s14, [#allocation4], %s3005_s13, %s3005_s13, %s3006_s17  }
  0x58   : > { %p2877_p12 = por %p2876_p10, %p2875_p9 }
  0x5a   : > { %p2878_p13 = pnand %p2877_p12, %p2871_p8 }
  0x5c   : > { %2881 = shalt.err (!%p2878_p13)
}
  0x5d   : > { %s3602_s28 = smov 64   ;;  %s2895_s14 = scalar_lea.vmem %s3171_s11, 1024 }
  0x5e   : > { %2567 = dma.hbm_to_vmem [thread:$0]  (!%p3132_p6), %s3204_s15, 2048, %s3206_s5, %s3138_s12, %s3602_s28, %s3602_s28, %s3003_s9  }
  0x5f   : > { %p2896_p3 = scmp.ne.s32.totalorder %s3171_s11, %s2895_s14  ;;  %s3008_s1 = smov [#allocation11]  }
  0x60   : > { %s2900_s13 = sshll.u32 %s3008_s1, 4  ;;  %s2901_s13 = int_to_ptr.vmem [resolvable:$false] %s2900_s13 }
  0x61   : > { %p2898_p2 = pnand %p2896_p3, %p2774_p7  ;;  %s2902_s17 = scalar_lea.vmem %s2901_s13, 2048 }
  0x62   : > { %p2903_p5 = scmp.lt.s32.totalorder %s3171_s11, %s2901_s13  ;;  %p2904_p8 = scmp.lt.s32.totalorder %s2902_s17, %s2895_s14 }
  0x63   : > { %p2899_p4 = pneg %p2898_p2 }
  0x64   : > { %p2905_p9 = por %p2904_p8, %p2903_p5 }
  0x66   : > { %p2906_p10 = pnand %p2905_p9, %p2899_p4 }
  0x68   : > { %2909 = shalt.err (!%p2906_p10)
}
  0x69   : > { %2573 = dma.hbm_to_vmem [thread:$0]  (!%p3132_p6), %s3156_s10, 1024, %s3171_s11, %s3160_s7, %s3602_s28, %s3602_s28, %s3003_s9  }
  0x6a   : > { %526 = sbr.rel (%p3187_p1) target bundleno = 2869 (0xb35), region = 68 }
  0x6f   : > { %2959 = dma.done.wait (%p89_p11), [#allocation4], 256  }
  0x70   : > { %2961 = vsyncadd (%p89_p11), [#allocation4], 4294967040  ;;  %s532_s12 = sand.u32 1, %s3174_s23   ;;  %s534_s20 = sand.u32 1, %s2980_s22  }
  0x71   : > { %s2540_s15 = smul.u32 384, %s534_s20  ;;  %s533_s5 = scalar_lea.sflag [#allocation7], %s532_s12 }
  0x73   : > { %s3251_s21 = scalar_lea.vmem [#allocation6], %s2540_s15 }
  0x74   : > { %2963 = dma.done.wait (%p3183_p0), %s533_s5, 8192  }
  0x75   : > { %2965 = vsyncadd (%p3183_p0), %s533_s5, 4294959104  ;;  %s2254_s7 = sshll.u32 %s534_s20, 7  ;;  %s2255_s10 = sshll.u32 %s534_s20, 6 }
  0x76   : > { %s3257_s9 = scalar_lea.vmem [#allocation8], %s2254_s7  ;;  %s551_s11 = scalar_lea.sflag [#allocation10], %s532_s12 }
  0x77   : > { %s3259_s16 = scalar_lea.vmem [#allocation9], %s2255_s10 }
  0x78   : > { %2967 = dma.done.wait (%p3183_p0), %s551_s11, 2048  }
  0x79   : > { %2969 = vsyncadd (%p3183_p0), %s551_s11, 4294965248  ;;  %p630_p6 = scmp.lt.s32.totalorder %s2988_s24, 1  ;;  %v647_v0 = vlaneseq  ;;  %s3603_s17 = sld [smem:[#allocation22_spill]]  ;;  %v3009_v2 = vmov 0.0  }
  0x7a   : > { %s3604_s5 = sld [smem:[#allocation23_spill]]  ;;  %s3292_s0 = scalar_lea.vmem [#allocation11], %s2255_s10 }
  0x7b   : > { %s3267_s18 = scalar_select %p630_p6, %s2988_s24, 1  ;;  %v648_v1 = vand.u32 127, %v647_v0 }
  0x7c   : > { %s3605_s19 = sld [smem:[#allocation24_spill]]  ;;  %p2258_p7 = scmp.ne.s32.totalorder %s2988_s24, 0 }
  0x7d   : > { %s635_s27 = scalar_lea.vmem %s3570_s4, %s3267_s18  ;;  %vm649_vm0 = vcmp.lt.s32.totalorder %v648_v1, 32 }
  0x7e   : > { %v3286_v3 = vsel %vm649_vm0, 1.0, %v3009_v2  ;;  %655 = sbr.rel (%p2258_p7) target bundleno = 133 (0x85), region = 92 }
  0x7f   : > { %s638_s12 = scalar_lea.vmem %s3603_s17, %s3267_s18 }
  0x80   : > { %s641_s7 = scalar_lea.vmem %s3604_s5, %s3267_s18 }
  0x82   : > { %s644_s29 = scalar_lea.vmem %s3605_s19, %s3267_s18 }
  0x83   : > { %v656_v4 = vld [vmem:[#allocation3] sm:$0xff]  ;;  %v657_v5 = vld [vmem:[#allocation3 + $0x8] sm:$0xff] }
  0x84   : > { %658 = vst [vmem:[#allocation2] sm:$0xff] %v656_v4  ;;  %659 = vst [vmem:[#allocation2 + $0x8] sm:$0xff] %v657_v5 }
  0x85 PF: > { %v2640_v6 = vld [vmem:[%s3251_s21 + $0x15c] ss:$24 sps:$4 sm:$0xff]   ;;  %v2642_v7 = vld [vmem:[%s3251_s21 + $0x158] ss:$24 sps:$4 sm:$0xff]   ;;  %v3010_v8 = vmov 0   ;;  %vm3011_vm1 = vmmov 0  }
  0x86   : > { %1026 = vmatprep.mubr.bf16.mxu1 %v3010_v8  ;;  %983 = vmatprep.mubr.bf16.mxu0 %v3010_v8  ;;  %v2643_v9 = vld [vmem:[%s3251_s21 + $0x154] ss:$24 sps:$4 sm:$0xff]   ;;  %v2645_v10 = vld [vmem:[%s3251_s21 + $0x150] ss:$24 sps:$4 sm:$0xff]   ;;  %v2649_v13 = vld [vmem:[%s3251_s21 + $0x124] ss:$24 sps:$4 sm:$0xff]  }
  0x87   : > { %994 = vmatprep.subr.bf16.mxu1 %v2640_v6  ;;  %v2646_v11 = vld [vmem:[%s3251_s21 + $0x12c] ss:$24 sps:$4 sm:$0xff]   ;;  %v2648_v12 = vld [vmem:[%s3251_s21 + $0x128] ss:$24 sps:$4 sm:$0xff]   ;;  %951 = vmatprep.subr.bf16.mxu0 %v2643_v9  ;;  %v2652_v15 = vld [vmem:[%s3251_s21 + $0xfc] ss:$24 sps:$4 sm:$0xff]  }
  0x88   : > { %995 = vmatpush1.bf16.msra.mxu1 %v2642_v7  ;;  %952 = vmatpush1.bf16.msra.mxu0 %v2645_v10  ;;  %v2651_v14 = vld [vmem:[%s3251_s21 + $0x120] ss:$24 sps:$4 sm:$0xff]   ;;  %v2655_v17 = vld [vmem:[%s3251_s21 + $0xf4] ss:$24 sps:$4 sm:$0xff]   ;;  %v2657_v19 = vld [vmem:[%s3251_s21 + $0xf0] ss:$24 sps:$4 sm:$0xff]  }
  0x89   : > { %996 = vmatprep.subr.bf16.mxu1 %v2646_v11  ;;  %953 = vmatprep.subr.bf16.mxu0 %v2649_v13  ;;  %v2654_v16 = vld [vmem:[%s3251_s21 + $0xf8] ss:$24 sps:$4 sm:$0xff]   ;;  %v2658_v18 = vld [vmem:[%s3251_s21 + $0xcc] ss:$24 sps:$4 sm:$0xff]   ;;  %v2660_v21 = vld [vmem:[%s3251_s21 + $0xc8] ss:$24 sps:$4 sm:$0xff]  }
  0x8a   : > { %v2661_v20 = vld [vmem:[%s3251_s21 + $0xc4] ss:$24 sps:$4 sm:$0xff]   ;;  %v2663_v23 = vld [vmem:[%s3251_s21 + $0xc0] ss:$24 sps:$4 sm:$0xff]   ;;  %v2667_v24 = vld [vmem:[%s3251_s21 + $0x94] ss:$24 sps:$4 sm:$0xff]  }
  0x8b   : > { %v2664_v22 = vld [vmem:[%s3251_s21 + $0x9c] ss:$24 sps:$4 sm:$0xff]   ;;  %v2666_v25 = vld [vmem:[%s3251_s21 + $0x98] ss:$24 sps:$4 sm:$0xff]   ;;  %v2670_v26 = vld [vmem:[%s3251_s21 + $0x6c] ss:$24 sps:$4 sm:$0xff]  }
  0x8c   : > { %997 = vmatpush1.bf16.msra.mxu1 %v2648_v12  ;;  %954 = vmatpush1.bf16.msra.mxu0 %v2651_v14  ;;  %v2669_v27 = vld [vmem:[%s3251_s21 + $0x90] ss:$24 sps:$4 sm:$0xff]   ;;  %v2673_v28 = vld [vmem:[%s3251_s21 + $0x64] ss:$24 sps:$4 sm:$0xff]   ;;  %v2675_v31 = vld [vmem:[%s3251_s21 + $0x60] ss:$24 sps:$4 sm:$0xff]  }
  0x8d   : > { %998 = vmatprep.subr.bf16.mxu1 %v2652_v15  ;;  %955 = vmatprep.subr.bf16.mxu0 %v2655_v17  ;;  %v2672_v29 = vld [vmem:[%s3251_s21 + $0x68] ss:$24 sps:$4 sm:$0xff]   ;;  %v2676_v30 = vld [vmem:[%s3251_s21 + $0x3c] ss:$24 sps:$4 sm:$0xff]   ;;  %v2678_v33 = vld [vmem:[%s3251_s21 + $0x38] ss:$24 sps:$4 sm:$0xff]  }
  0x8e   : > { %v2679_v32 = vld [vmem:[%s3251_s21 + $0x34] ss:$24 sps:$4 sm:$0xff]   ;;  %v2681_v34 = vld [vmem:[%s3251_s21 + $0x30] ss:$24 sps:$4 sm:$0xff]   ;;  %v2685_v37 = vld [vmem:[%s3251_s21 + $0x4] ss:$24 sps:$4 sm:$0xff]  }
  0x8f   : > { %v2682_v35 = vld [vmem:[%s3251_s21 + $0xc] ss:$24 sps:$4 sm:$0xff]   ;;  %v2684_v36 = vld [vmem:[%s3251_s21 + $0x8] ss:$24 sps:$4 sm:$0xff]   ;;  %vm1228_vm2 = vcmask 1043456   ;;  %vm1200_vm3 = vcmask 64512  }
  0x90   : > { %999 = vmatpush1.bf16.msra.mxu1 %v2654_v16  ;;  %956 = vmatpush1.bf16.msra.mxu0 %v2657_v19  ;;  %v3328_v38 = vld [vmem:[#allocation2] sm:$0xff]  ;;  %v3330_v39 = vld [vmem:[#allocation2 + $0x8] sm:$0xff]  ;;  %p2348_p11 = scmp.ne.s32.totalorder %s2988_s24, 1 }
  0x91   : > { %1000 = vmatprep.subr.bf16.mxu1 %v2658_v18  ;;  %957 = vmatprep.subr.bf16.mxu0 %v2661_v20  ;;  %v2687_v40 = vld [vmem:[%s3251_s21] ss:$24 sps:$4 sm:$0xff]   ;;  %v662_v41 = vpack.c.bf16 %v3330_v39, %v3328_v38  ;;  %v2690_v42 = vld [vmem:[%s3251_s21 + $0x164] ss:$24 sps:$4 sm:$0xff]   ;;  %v2693_v44 = vld [vmem:[%s3251_s21 + $0x134] ss:$24 sps:$4 sm:$0xff]  }
  0x92   : > { %v2688_v43 = vld [vmem:[%s3251_s21 + $0x160] ss:$24 sps:$4 sm:$0xff]   ;;  %v2691_v45 = vld [vmem:[%s3251_s21 + $0x130] ss:$24 sps:$4 sm:$0xff]   ;;  %v2696_v46 = vld [vmem:[%s3251_s21 + $0x104] ss:$24 sps:$4 sm:$0xff]  }
  0x93   : > { %v2694_v47 = vld [vmem:[%s3251_s21 + $0x100] ss:$24 sps:$4 sm:$0xff]   ;;  %v2699_v48 = vld [vmem:[%s3251_s21 + $0xd4] ss:$24 sps:$4 sm:$0xff]   ;;  %v2697_v49 = vld [vmem:[%s3251_s21 + $0xd0] ss:$24 sps:$4 sm:$0xff]  }
  0x94   : > { %1001 = vmatpush1.bf16.msra.mxu1 %v2660_v21  ;;  %958 = vmatpush1.bf16.msra.mxu0 %v2663_v23  ;;  %v2702_v50 = vld [vmem:[%s3251_s21 + $0xa4] ss:$24 sps:$4 sm:$0xff]   ;;  %v2700_v51 = vld [vmem:[%s3251_s21 + $0xa0] ss:$24 sps:$4 sm:$0xff]   ;;  %v2705_v52 = vld [vmem:[%s3251_s21 + $0x74] ss:$24 sps:$4 sm:$0xff]  }
  0x95   : > { %1002 = vmatprep.subr.bf16.mxu1 %v2664_v22  ;;  %959 = vmatprep.subr.bf16.mxu0 %v2667_v24  ;;  %v2703_v53 = vld [vmem:[%s3251_s21 + $0x70] ss:$24 sps:$4 sm:$0xff]   ;;  %v2708_v54 = vld [vmem:[%s3251_s21 + $0x44] ss:$24 sps:$4 sm:$0xff]   ;;  %v2706_v55 = vld [vmem:[%s3251_s21 + $0x40] ss:$24 sps:$4 sm:$0xff]  }
  0x96   : > { %v2711_v56 = vld [vmem:[%s3251_s21 + $0x14] ss:$24 sps:$4 sm:$0xff]   ;;  %v2709_v57 = vld [vmem:[%s3251_s21 + $0x10] ss:$24 sps:$4 sm:$0xff]   ;;  %s3611_s11 = sld [smem:[#allocation26_spill]] (!%p2348_p11) }
  0x98   : > { %1003 = vmatpush1.bf16.msra.mxu1 %v2666_v25  ;;  %960 = vmatpush1.bf16.msra.mxu0 %v2669_v27 }
  0x99   : > { %1004 = vmatprep.subr.bf16.mxu1 %v2670_v26  ;;  %961 = vmatprep.subr.bf16.mxu0 %v2673_v28 }
  0x9c   : > { %1005 = vmatpush1.bf16.msra.mxu1 %v2672_v29  ;;  %962 = vmatpush1.bf16.msra.mxu0 %v2675_v31 }
  0x9d   : > { %1006 = vmatprep.subr.bf16.mxu1 %v2676_v30  ;;  %963 = vmatprep.subr.bf16.mxu0 %v2679_v32 }
  0xa0   : > { %1007 = vmatpush1.bf16.msra.mxu1 %v2678_v33  ;;  %964 = vmatpush1.bf16.msra.mxu0 %v2681_v34 }
  0xa1   : > { %1008 = vmatprep.subr.bf16.mxu1 %v2682_v35  ;;  %965 = vmatprep.subr.bf16.mxu0 %v2685_v37 }
  0xa4   : > { %1009 = vmatpush1.bf16.msra.mxu1 %v2684_v36  ;;  %966 = vmatpush1.bf16.msra.mxu0 %v2687_v40 }
  0xa5   : > { %2410 = vmatprep.subr.bf16.mxu1 %v3009_v2  ;;  %1037 = vmatprep.subr.bf16.mxu0 %v2690_v42 }
  0xa7   : > { %1027 = vmatmul.mubr.bf16.vlgmr.msra.gmra.mxu1 %v662_v41  ;;  %984 = vmatmul.mubr.bf16.vlgmr.msra.gmra.mxu0 %v662_v41 }
  0xa8   : > { %1038 = vmatpush1.bf16.msra.mxu0 %v2688_v43  ;;  %1069 = vmatprep.mubr.bf16.mxu0 %v3010_v8 }
  0xa9   : > { %1039 = vmatprep.subr.bf16.mxu0 %v2693_v44  ;;  %2412 = vmatprep.mubr.msk.bf16.mxu1 %vm3011_vm1, %v3009_v2 }
  0xac   : > { %1040 = vmatpush1.bf16.msra.mxu0 %v2691_v45 }
  0xad   : > { %1041 = vmatprep.subr.bf16.mxu0 %v2696_v46 }
  0xb0   : > { %1042 = vmatpush1.bf16.msra.mxu0 %v2694_v47 }
  0xb1   : > { %1043 = vmatprep.subr.bf16.mxu0 %v2699_v48 }
  0xb4   : > { %1044 = vmatpush1.bf16.msra.mxu0 %v2697_v49 }
  0xb5   : > { %1045 = vmatprep.subr.bf16.mxu0 %v2702_v50 }
  0xb8   : > { %1046 = vmatpush1.bf16.msra.mxu0 %v2700_v51 }
  0xb9   : > { %1047 = vmatprep.subr.bf16.mxu0 %v2705_v52 }
  0xbc   : > { %1048 = vmatpush1.bf16.msra.mxu0 %v2703_v53 }
  0xbd   : > { %1049 = vmatprep.subr.bf16.mxu0 %v2708_v54 }
  0xc0   : > { %1050 = vmatpush1.bf16.msra.mxu0 %v2706_v55 }
  0xc1   : > { %1051 = vmatprep.subr.bf16.mxu0 %v2711_v56 }
  0xc4   : > { %1052 = vmatpush1.bf16.msra.mxu0 %v2709_v57 }
  0xc5   : > { %2434 = vmatprep.subr.bf16.mxu0 %v3009_v2 }
  0xc7   : > { %1070 = vmatmul.mubr.bf16.vlgmr.msra.gmra.mxu0 %v662_v41 }
  0xc8   : > { %2436 = vmatprep.mubr.msk.bf16.mxu0 %vm3011_vm1, %v3009_v2 }
 0x167   : > { %v1028_v58 = vpop.f32.mrf.mxu1  ;;  %v985_v62 = vpop.f32.mrf.mxu0 }
 0x168   : > { %v1114_v59 = vpack.c.bf16 %v1028_v58, %v1028_v58  ;;  %v1112_v63 = vpack.c.bf16 %v985_v62, %v985_v62 }
 0x169   : > { %v1030_v60 = vpop.f32.mrf.mxu1  ;;  %v987_v1 = vpop.f32.mrf.mxu0 }
 0x16a   : > { %v1321_v61 = vpack.c.bf16 %v1030_v60, %v1030_v60  ;;  %2411 = vmatpush3.bf16.xpose.msra.mxu1 %v1114_v59  ;;  %v1319_v5 = vpack.c.bf16 %v987_v1, %v987_v1 }
 0x16b   : > { %2416 = vmatprep.subr.bf16.mxu1 %v3009_v2  ;;  %v1032_v0 = vpop.f32.mrf.mxu1  ;;  %v989_v6 = vpop.f32.mrf.mxu0 }
 0x16c   : > { %2435 = vmatpush3.bf16.xpose.msra.mxu0 %v1321_v61  ;;  %v1115_v4 = vpack.c.bf16 %v1032_v0, %v1032_v0  ;;  %v1113_v7 = vpack.c.bf16 %v989_v6, %v989_v6 }
 0x16d   : > { %2446 = vmatprep.subr.bf16.mxu0 %v3009_v2  ;;  %v3367_v8 = vpop.f32.mrf.mxu0  ;;  %v3374_v18 = vpop.f32.mrf.mxu1 }
 0x16e   : > { %v1322_v1 = vpack.c.bf16 %v3374_v18, %v3374_v18 }
 0x171   : > { %2413 = vmatmul.mubr.bf16.vlgmr.msra.gmra.mxu1 %v1112_v63 }
 0x172   : > { %2417 = vmatpush3.bf16.xpose.msra.mxu1 %v1115_v4  ;;  %2418 = vmatprep.mubr.msk.bf16.mxu1 %vm3011_vm1, %v3009_v2 }
 0x173   : > { %2437 = vmatmul.mubr.bf16.vlgmr.msra.gmra.mxu0 %v1319_v5  ;;  %2422 = vmatprep.subr.bf16.mxu1 %v3009_v2 }
 0x174   : > { %2448 = vmatprep.mubr.msk.bf16.mxu0 %vm3011_vm1, %v3009_v2 }
 0x179   : > { %2419 = vmatmul.mubr.bf16.vlgmr.msra.gmra.mxu1 %v1113_v7  ;;  %v1320_v7 = vpack.c.bf16 %v3367_v8, %v3367_v8 }
 0x17a   : > { %2424 = vmatprep.mubr.msk.bf16.mxu1 %vm3011_vm1, %v3009_v2 }
 0x187   : > { %v1071_v9 = vpop.f32.mrf.mxu0 }
 0x188   : > { %v1116_v10 = vpack.c.bf16 %v1071_v9, %v1071_v9 }
 0x189   : > { %v1073_v11 = vpop.f32.mrf.mxu0 }
 0x18a   : > { %v1230_v12 = vsel %vm1228_vm2, %v1116_v10, 0  ;;  %v1323_v13 = vpack.c.bf16 %v1073_v11, %v1073_v11 }
 0x18b   : > { %v1075_v14 = vpop.f32.mrf.mxu0  ;;  %2423 = vmatpush3.bf16.msra.mxu1 %v1230_v12 }
 0x18c   : > { %v1435_v15 = vsel %vm1228_vm2, %v1323_v13, 0  ;;  %v1117_v16 = vpack.c.bf16 %v1075_v14, %v1075_v14  ;;  %2428 = vmatprep.subr.bf16.mxu1 %v3009_v2 }
 0x18d   : > { %2447 = vmatpush3.bf16.msra.mxu0 %v1435_v15  ;;  %v3376_v19 = vpop.f32.mrf.mxu0 }
 0x18e   : > { %v1276_v17 = vsel %vm1228_vm2, %v1117_v16, 0  ;;  %2458 = vmatprep.subr.bf16.mxu0 %v3009_v2  ;;  %v1324_v6 = vpack.c.bf16 %v3376_v19, %v3376_v19 }
 0x190   : > { %v1481_v9 = vsel %vm1228_vm2, %v1324_v6, 0 }
 0x231   : > { %v1152_v20 = vpop.f32.mrf.mxu1 }
 0x232   : > { %v1198_v21 = vmul.f32 0.25, %v1152_v20 }
 0x233   : > { %v2414_v22 = vpop.f32.mrf.mxu1  ;;  %v1359_v23 = vpop.f32.mrf.mxu0 }
 0x234   : > { %v1201_v24 = vsel %vm1200_vm3, %v1198_v21, -inf  ;;  %v1405_v33 = vmul.f32 0.25, %v1359_v23 }
 0x235   : > { %1202 = vmax.xlane.f32.xlu0 %v1201_v24  ;;  %v1155_v25 = vpop.f32.mrf.mxu1  ;;  %v2438_v26 = vpop.f32.mrf.mxu0 }
 0x236   : > { %v1407_v37 = vsel %vm1200_vm3, %v1405_v33, -inf }
 0x237   : > { %v2415_v27 = vpop.f32.mrf.mxu1  ;;  %v1362_v28 = vpop.f32.mrf.mxu0 }
 0x239   : > { %v1192_v29 = vpop.f32.mrf.mxu1  ;;  %v2439_v30 = vpop.f32.mrf.mxu0 }
 0x23a   : > { %v1199_v31 = vmul.f32 0.25, %v1192_v29 }
 0x23b   : > { %v2420_v32 = vpop.f32.mrf.mxu1 }
 0x23c   : > { %v1204_v34 = vsel %vm1200_vm3, %v1199_v31, -inf }
 0x23d   : > { %1205 = vmax.xlane.f32.xlu0 %v1204_v34  ;;  %v1195_v35 = vpop.f32.mrf.mxu1  ;;  %v2721_v34 = vld [vmem:[%s3257_s9 + $0x70] sm:$0xff]  }
 0x23e   : > { %v2722_v35 = vld [vmem:[%s3257_s9 + $0x68] sm:$0xff]  }
 0x23f   : > { %v2421_v36 = vpop.f32.mrf.mxu1 }
 0x240   : > { %v2723_v36 = vld [vmem:[%s3257_s9 + $0x60] sm:$0xff]  }
 0x241   : > { %1408 = vmax.xlane.f32.xlu0 %v1407_v37  ;;  %v2724_v37 = vld [vmem:[%s3257_s9 + $0x58] sm:$0xff]  }
 0x2be   : > { %v1203_v40 = vpop.xlane.xlu0 %1202 }
 0x2bf   : > { %v1207_v41 = vsub.f32 %v1198_v21, %v1203_v40  ;;  %v2725_v40 = vld [vmem:[%s3257_s9 + $0x50] sm:$0xff]  }
 0x2c1   : > { %v1209_v42 = vmul.f32 1.442695, %v1207_v41  ;;  %v2726_v41 = vld [vmem:[%s3257_s9 + $0x48] sm:$0xff]  }
 0x2c3   : > { %2744 = vpow2.f32 %v1209_v42 }
 0x2c6   : > { %v1206_v43 = vpop.xlane.xlu0 %1205 }
 0x2c7   : > { %v1208_v44 = vsub.f32 %v1199_v31, %v1206_v43 }
 0x2c9   : > { %v1211_v45 = vmul.f32 1.442695, %v1208_v44 }
 0x2ca   : > { %v1409_v46 = vpop.xlane.xlu0 %1408 }
 0x2cb   : > { %2746 = vpow2.f32 %v1211_v45  ;;  %v1413_v47 = vsub.f32 %v1405_v33, %v1409_v46  ;;  %v2720_v33 = vld [vmem:[%s3257_s9 + $0x78] sm:$0xff]  }
 0x2cc   : > { %v2712_v45 = vld [vmem:[%s3257_s9 + $0x38] sm:$0xff]  }
 0x2cd   : > { %v1415_v48 = vmul.f32 1.442695, %v1413_v47  ;;  %v2713_v47 = vld [vmem:[%s3257_s9 + $0x30] sm:$0xff]  }
 0x2cf   : > { %2748 = vpow2.f32 %v1415_v48  ;;  %v2714_v48 = vld [vmem:[%s3257_s9 + $0x28] sm:$0xff]  }
 0x2d0   : > { %v2745_v49 = vpop.eup %2744 }
 0x2d1   : > { %v1213_v50 = vsel %vm1200_vm3, %v2745_v49, 0.0 }
 0x2d2   : > { %1214 = vadd.xlane.f32.xlu1 %v1213_v50  ;;  %v2716_v50 = vld [vmem:[%s3257_s9 + $0x18] sm:$0xff]  }
 0x2d8   : > { %v2747_v51 = vpop.eup %2746 }
 0x2d9   : > { %v1216_v52 = vsel %vm1200_vm3, %v2747_v51, 0.0 }
 0x2da   : > { %1217 = vadd.xlane.f32.xlu1 %v1216_v52  ;;  %v2718_v52 = vld [vmem:[%s3257_s9 + $0x8] sm:$0xff]  }
 0x2dc   : > { %v2749_v53 = vpop.eup %2748 }
 0x2dd   : > { %v1419_v54 = vsel %vm1200_vm3, %v2749_v53, 0.0 }
 0x2de   : > { %1420 = vadd.xlane.f32.xlu0 %v1419_v54  ;;  %v2727_v54 = vld [vmem:[%s3257_s9 + $0x40] sm:$0xff]  }
 0x35b   : > { %v1215_v55 = vpop.xlane.xlu1 %1214 }
 0x35c   : > { %2750 = vrcp.f32 %v1215_v55 }
 0x363   : > { %v1218_v56 = vpop.xlane.xlu1 %1217 }
 0x364   : > { %2752 = vrcp.f32 %v1218_v56 }
 0x367   : > { %v1421_v57 = vpop.xlane.xlu0 %1420 }
 0x368   : > { %2754 = vrcp.f32 %v1421_v57 }
 0x369   : > { %v2751_v58 = vpop.eup %2750 }
 0x36a   : > { %v1221_v59 = vmul.f32 %v2751_v58, %v2745_v49  ;;  %v2715_v49 = vld [vmem:[%s3257_s9 + $0x20] sm:$0xff]  }
 0x36c   : > { %v1223_v60 = vpack.c.bf16 %v1221_v59, %v1221_v59 }
 0x36e   : > { %2425 = vmatmul.mubr.msk.bf16.vlgmr.msra.gmra.mxu1 %vm1200_vm3, %v1223_v60 }
 0x36f   : > { %2429 = vmatpush3.bf16.msra.mxu1 %v1276_v17  ;;  %2430 = vmatprep.mubr.msk.bf16.mxu1 %vm3011_vm1, %v3009_v2 }
 0x370   : > { %2440 = vmatprep.subr.bf16.mxu1 %v3009_v2 }
 0x371   : > { %v2753_v61 = vpop.eup %2752 }
 0x372   : > { %v1222_v62 = vmul.f32 %v2753_v61, %v2747_v51  ;;  %v2717_v51 = vld [vmem:[%s3257_s9 + $0x10] sm:$0xff]  }
 0x374   : > { %v1224_v63 = vpack.c.bf16 %v1222_v62, %v1222_v62 }
 0x375   : > { %v2755_v0 = vpop.eup %2754 }
 0x376   : > { %2431 = vmatmul.mubr.msk.bf16.vlgmr.msra.gmra.mxu1 %vm1200_vm3, %v1224_v63  ;;  %v1427_v4 = vmul.f32 %v2755_v0, %v2749_v53  ;;  %v2719_v53 = vld [vmem:[%s3257_s9] sm:$0xff]   ;;  %s3606_s9 = scalar_lea.vmem %s3569_s3, %s3267_s18 }
 0x377   : > { %2441 = vmatpush3.bf16.xpose.msra.mxu1 %v1322_v1  ;;  %2442 = vmatprep.mubr.msk.bf16.mxu1 %vm3011_vm1, %v3009_v2  ;;  %v2327_v1 = vld [vmem:[%s3606_s9] ss:$0 sm:$0xff] }
 0x378   : > { %v1429_v5 = vpack.c.bf16 %v1427_v4, %v1427_v4  ;;  %2452 = vmatprep.subr.bf16.mxu1 %v3009_v2 }
 0x37a   : > { %2449 = vmatmul.mubr.msk.bf16.vlgmr.msra.gmra.mxu0 %vm1200_vm3, %v1429_v5 }
 0x37b   : > { %2474 = vmatprep.mubr.msk.bf16.mxu0 %vm3011_vm1, %v3009_v2  ;;  %2459 = vmatpush3.bf16.msra.mxu0 %v2720_v33 }
 0x37c   : > { %2460 = vmatprep.subr.bf16.mxu0 %v3009_v2 }
 0x37e   : > { %2443 = vmatmul.mubr.bf16.vlgmr.msra.gmra.mxu1 %v1320_v7 }
 0x37f   : > { %2453 = vmatpush3.bf16.msra.mxu1 %v1481_v9  ;;  %2454 = vmatprep.mubr.msk.bf16.mxu1 %vm3011_vm1, %v3009_v2 }
 0x380   : > { %2478 = vmatprep.subr.bf16.mxu1 %v3009_v2  ;;  %2461 = vmatpush3.bf16.msra.mxu0 %v2721_v34 }
 0x381   : > { %2462 = vmatprep.subr.bf16.mxu0 %v3009_v2 }
 0x384   : > { %2463 = vmatpush3.bf16.msra.mxu0 %v2722_v35 }
 0x385   : > { %2464 = vmatprep.subr.bf16.mxu0 %v3009_v2 }
 0x388   : > { %2465 = vmatpush3.bf16.msra.mxu0 %v2723_v36 }
 0x389   : > { %2466 = vmatprep.subr.bf16.mxu0 %v3009_v2 }
 0x38c   : > { %2467 = vmatpush3.bf16.msra.mxu0 %v2724_v37 }
 0x38d   : > { %2468 = vmatprep.subr.bf16.mxu0 %v3009_v2 }
 0x390   : > { %2469 = vmatpush3.bf16.msra.mxu0 %v2725_v40  ;;  %v2328_v40 = vld [vmem:[%s635_s27] ss:$0 sm:$0xff] }
 0x391   : > { %2470 = vmatprep.subr.bf16.mxu0 %v3009_v2 }
 0x394   : > { %2471 = vmatpush3.bf16.msra.mxu0 %v2726_v41 }
 0x395   : > { %2472 = vmatprep.subr.bf16.mxu0 %v3009_v2 }
 0x398   : > { %2473 = vmatpush3.bf16.msra.mxu0 %v2727_v54  ;;  %v2742_v54 = vld [vmem:[%s3292_s0 + $0x8] sm:$0xff]  }
 0x399   : > { %2498 = vmatprep.subr.bf16.mxu0 %v3009_v2 }
 0x42e   : > { %v3405_v10 = vpop.f32.mrf.mxu1 }
 0x430   : > { %v2426_v11 = vpop.f32.mrf.mxu1 }
 0x432   : > { %v1269_v12 = vpop.f32.mrf.mxu1 }
 0x434   : > { %v2427_v13 = vpop.f32.mrf.mxu1 }
 0x436   : > { %v3407_v14 = vpop.f32.mrf.mxu1 }
 0x437   : > { %v1318_v15 = vpack.c.bf16 %v3407_v14, %v3405_v10  ;;  %v2728_v14 = vld [vmem:[%s3259_s16 + $0x38] sm:$0xff]  }
 0x438   : > { %v2432_v8 = vpop.f32.mrf.mxu1 }
 0x43a   : > { %v1315_v16 = vpop.f32.mrf.mxu1  ;;  %v3411_v17 = vpop.f32.mrf.mxu0 }
 0x43c   : > { %v2433_v18 = vpop.f32.mrf.mxu1  ;;  %v2450_v19 = vpop.f32.mrf.mxu0 }
 0x43e   : > { %v1399_v20 = vpop.f32.mrf.mxu1  ;;  %v1474_v21 = vpop.f32.mrf.mxu0 }
 0x43f   : > { %v1406_v22 = vmul.f32 0.25, %v1399_v20 }
 0x440   : > { %v2444_v23 = vpop.f32.mrf.mxu1  ;;  %v2451_v24 = vpop.f32.mrf.mxu0 }
 0x441   : > { %v1410_v25 = vsel %vm1200_vm3, %v1406_v22, -inf  ;;  %v2730_v23 = vld [vmem:[%s3259_s16 + $0x28] sm:$0xff]   ;;  %v2731_v24 = vld [vmem:[%s3259_s16 + $0x20] sm:$0xff]  }
 0x442   : > { %1411 = vmax.xlane.f32.xlu1 %v1410_v25  ;;  %v1402_v26 = vpop.f32.mrf.mxu1  ;;  %v2732_v25 = vld [vmem:[%s3259_s16 + $0x18] sm:$0xff]  }
 0x443   : > { %v2733_v26 = vld [vmem:[%s3259_s16 + $0x10] sm:$0xff]  }
 0x444   : > { %v2445_v27 = vpop.f32.mrf.mxu1 }
 0x445   : > { %v2734_v27 = vld [vmem:[%s3259_s16 + $0x8] sm:$0xff]  }
 0x4cb   : > { %v1412_v28 = vpop.xlane.xlu1 %1411 }
 0x4cc   : > { %v1414_v29 = vsub.f32 %v1406_v22, %v1412_v28  ;;  %v2729_v22 = vld [vmem:[%s3259_s16 + $0x30] sm:$0xff]   ;;  %v2735_v28 = vld [vmem:[%s3259_s16] sm:$0xff]  }
 0x4ce   : > { %v1417_v30 = vmul.f32 1.442695, %v1414_v29  ;;  %v2736_v29 = vld [vmem:[%s3292_s0 + $0x38] sm:$0xff]  }
 0x4d0   : > { %2756 = vpow2.f32 %v1417_v30 }
 0x4dd   : > { %v2757_v31 = vpop.eup %2756 }
 0x4de   : > { %v1422_v32 = vsel %vm1200_vm3, %v2757_v31, 0.0 }
 0x4df   : > { %1423 = vadd.xlane.f32.xlu1 %v1422_v32 }
 0x568   : > { %v1424_v42 = vpop.xlane.xlu1 %1423 }
 0x569   : > { %2758 = vrcp.f32 %v1424_v42 }
 0x576   : > { %v2759_v43 = vpop.eup %2758 }
 0x577   : > { %v1428_v44 = vmul.f32 %v2759_v43, %v2757_v31 }
 0x579   : > { %v1430_v46 = vpack.c.bf16 %v1428_v44, %v1428_v44  ;;  %v2329_v44 = vld [vmem:[%s638_s12] ss:$0 sm:$0xff] }
 0x57b   : > { %2455 = vmatmul.mubr.msk.bf16.vlgmr.msra.gmra.mxu1 %vm1200_vm3, %v1430_v46 }
 0x57c   : > { %2479 = vmatpush3.bf16.msra.mxu1 %v2712_v45  ;;  %2494 = vmatprep.mubr.msk.bf16.mxu1 %vm3011_vm1, %v3009_v2 }
 0x57d   : > { %2480 = vmatprep.subr.bf16.mxu1 %v3009_v2 }
 0x580   : > { %2481 = vmatpush3.bf16.msra.mxu1 %v2713_v47 }
 0x581   : > { %2482 = vmatprep.subr.bf16.mxu1 %v3009_v2 }
 0x584   : > { %2483 = vmatpush3.bf16.msra.mxu1 %v2714_v48 }
 0x585   : > { %2484 = vmatprep.subr.bf16.mxu1 %v3009_v2 }
 0x588   : > { %2485 = vmatpush3.bf16.msra.mxu1 %v2715_v49  ;;  %v2737_v49 = vld [vmem:[%s3292_s0 + $0x30] sm:$0xff]  }
 0x589   : > { %2486 = vmatprep.subr.bf16.mxu1 %v3009_v2 }
 0x58c   : > { %2487 = vmatpush3.bf16.msra.mxu1 %v2716_v50  ;;  %v2738_v50 = vld [vmem:[%s3292_s0 + $0x28] sm:$0xff]  }
 0x58d   : > { %2488 = vmatprep.subr.bf16.mxu1 %v3009_v2 }
 0x590   : > { %2489 = vmatpush3.bf16.msra.mxu1 %v2717_v51  ;;  %v2739_v51 = vld [vmem:[%s3292_s0 + $0x20] sm:$0xff]  }
 0x591   : > { %2490 = vmatprep.subr.bf16.mxu1 %v3009_v2 }
 0x594   : > { %2491 = vmatpush3.bf16.msra.mxu1 %v2718_v52  ;;  %v2740_v52 = vld [vmem:[%s3292_s0 + $0x18] sm:$0xff]  }
 0x595   : > { %2492 = vmatprep.subr.bf16.mxu1 %v3009_v2 }
 0x598   : > { %2493 = vmatpush3.bf16.msra.mxu1 %v2719_v53  ;;  %v2741_v53 = vld [vmem:[%s3292_s0 + $0x10] sm:$0xff]  }
 0x599   : > { %2518 = vmatprep.subr.bf16.mxu1 %v3009_v2 }
 0x59b   : > { %2495 = vmatmul.mubr.bf16.vlgmr.msra.gmra.mxu1 %v1318_v15 }
 0x59c   : > { %2534 = vmatprep.mubr.msk.bf16.mxu1 %vm3011_vm1, %v3009_v2  ;;  %2519 = vmatpush3.bf16.msra.mxu1 %v2736_v29 }
 0x59d   : > { %2520 = vmatprep.subr.bf16.mxu1 %v3009_v2 }
 0x5a0   : > { %2521 = vmatpush3.bf16.msra.mxu1 %v2737_v49 }
 0x5a1   : > { %2522 = vmatprep.subr.bf16.mxu1 %v3009_v2 }
 0x5a4   : > { %2523 = vmatpush3.bf16.msra.mxu1 %v2738_v50 }
 0x5a5   : > { %2524 = vmatprep.subr.bf16.mxu1 %v3009_v2 }
 0x5a8   : > { %2525 = vmatpush3.bf16.msra.mxu1 %v2739_v51 }
 0x5a9   : > { %2526 = vmatprep.subr.bf16.mxu1 %v3009_v2 }
 0x5ac   : > { %2527 = vmatpush3.bf16.msra.mxu1 %v2740_v52 }
 0x5ad   : > { %2528 = vmatprep.subr.bf16.mxu1 %v3009_v2 }
 0x5b0   : > { %2529 = vmatpush3.bf16.msra.mxu1 %v2741_v53 }
 0x5b1   : > { %2530 = vmatprep.subr.bf16.mxu1 %v3009_v2 }
 0x5b4   : > { %2531 = vmatpush3.bf16.msra.mxu1 %v2742_v54 }
 0x5b5   : > { %2532 = vmatprep.subr.bf16.mxu1 %v3009_v2 }
 0x63b   : > { %v1517_v55 = vpop.f32.mrf.mxu1 }
 0x63c   : > { %v1523_v56 = vpack.c.bf16 %v1517_v55, %v3411_v17  ;;  %v2743_v55 = vld [vmem:[%s3292_s0] sm:$0xff]  }
 0x63d   : > { %v2456_v57 = vpop.f32.mrf.mxu1  ;;  %2533 = vmatpush3.bf16.msra.mxu1 %v2743_v55 }
 0x63e   : > { %2475 = vmatmul.mubr.bf16.vlgmr.msra.gmra.mxu0 %v1523_v56  ;;  %v2330_v56 = vld [vmem:[%s641_s7] ss:$0 sm:$0xff] }
 0x63f   : > { %v1520_v58 = vpop.f32.mrf.mxu1  ;;  %2514 = vmatprep.mubr.msk.bf16.mxu0 %vm3011_vm1, %v3009_v2  ;;  %2499 = vmatpush3.bf16.msra.mxu0 %v2728_v14  ;;  %v2339_v14 = vld [vmem:[%s644_s29] ss:$0 sm:$0xff]  ;;  %s3610_s29 = sld [smem:[#allocation25_spill]] (!%p2348_p11) }
 0x640   : > { %2500 = vmatprep.subr.bf16.mxu0 %v3009_v2 }
 0x641   : > { %v2457_v59 = vpop.f32.mrf.mxu1 }
 0x643   : > { %2501 = vmatpush3.bf16.msra.mxu0 %v2729_v22 }
 0x644   : > { %2502 = vmatprep.subr.bf16.mxu0 %v3009_v2 }
 0x647   : > { %2503 = vmatpush3.bf16.msra.mxu0 %v2730_v23 }
 0x648   : > { %2504 = vmatprep.subr.bf16.mxu0 %v3009_v2 }
 0x64b   : > { %2505 = vmatpush3.bf16.msra.mxu0 %v2731_v24 }
 0x64c   : > { %2506 = vmatprep.subr.bf16.mxu0 %v3009_v2 }
 0x64f   : > { %2507 = vmatpush3.bf16.msra.mxu0 %v2732_v25 }
 0x650   : > { %2508 = vmatprep.subr.bf16.mxu0 %v3009_v2 }
 0x653   : > { %2509 = vmatpush3.bf16.msra.mxu0 %v2733_v26 }
 0x654   : > { %2510 = vmatprep.subr.bf16.mxu0 %v3009_v2 }
 0x657   : > { %2511 = vmatpush3.bf16.msra.mxu0 %v2734_v27 }
 0x658   : > { %2512 = vmatprep.subr.bf16.mxu0 %v3009_v2 }
 0x65b   : > { %v1695_v60 = vpop.f32.mrf.mxu1  ;;  %2513 = vmatpush3.bf16.msra.mxu0 %v2735_v28 }
 0x65d   : > { %v2496_v61 = vpop.f32.mrf.mxu1 }
 0x65f   : > { %v1698_v62 = vpop.f32.mrf.mxu1 }
 0x661   : > { %v2497_v63 = vpop.f32.mrf.mxu1 }
 0x6fe   : > { %v1606_v0 = vpop.f32.mrf.mxu0 }
 0x6ff   : > { %v1696_v4 = vadd.f32 %v1695_v60, %v1606_v0 }
 0x700   : > { %v2476_v5 = vpop.f32.mrf.mxu0 }
 0x701   : > { %v1709_v6 = vadd.f32 %v2327_v1, %v1696_v4 }
 0x702   : > { %v1609_v7 = vpop.f32.mrf.mxu0 }
 0x703   : > { %v1699_v9 = vadd.f32 %v1698_v62, %v1609_v7  ;;  %v3464_v10 = vadd.f32 %v1709_v6, %v3328_v38 }
 0x704   : > { %v2477_v11 = vpop.f32.mrf.mxu0 }
 0x705   : > { %v1710_v12 = vadd.f32 %v2327_v1, %v1699_v9  ;;  %1713 = vadd.xlane.f32.xlu0 %v3464_v10 }
 0x707   : > { %v3468_v13 = vadd.f32 %v1710_v12, %v3330_v39 }
 0x709   : > { %1715 = vadd.xlane.f32.xlu1 %v3468_v13 }
 0x78e   : > { %v1714_v15 = vpop.xlane.xlu0 %1713 }
 0x78f   : > { %v1717_v8 = vmul.f32 0.03125, %v1714_v15 }
 0x791   : > { %v1719_v38 = vsub.f32 %v3464_v10, %v1717_v8 }
 0x792   : > { %v1716_v16 = vpop.xlane.xlu1 %1715 }
 0x793   : > { %v1721_v17 = vmul.f32 %v3286_v3, %v1719_v38  ;;  %v1718_v18 = vmul.f32 0.03125, %v1716_v16 }
 0x795   : > { %v1720_v39 = vsub.f32 %v3468_v13, %v1718_v18  ;;  %v1723_v19 = vmul.f32 %v1721_v17, %v1721_v17 }
 0x797   : > { %v1722_v20 = vmul.f32 %v3286_v3, %v1720_v39  ;;  %1725 = vadd.xlane.f32.xlu0 %v1723_v19 }
 0x799   : > { %v1724_v21 = vmul.f32 %v1722_v20, %v1722_v20 }
 0x79b   : > { %1727 = vadd.xlane.f32.xlu1 %v1724_v21 }
 0x820   : > { %v1726_v30 = vpop.xlane.xlu0 %1725 }
 0x821   : > { %v1729_v31 = vmul.f32 0.03125, %v1726_v30 }
 0x823   : > { %v1731_v32 = vadd.f32 1e-05, %v1729_v31 }
 0x824   : > { %v1728_v33 = vpop.xlane.xlu1 %1727 }
 0x825   : > { %2760 = vrsqrt.f32 %v1731_v32  ;;  %v1730_v34 = vmul.f32 0.03125, %v1728_v33 }
 0x827   : > { %v1732_v35 = vadd.f32 1e-05, %v1730_v34 }
 0x829   : > { %2762 = vrsqrt.f32 %v1732_v35 }
 0x832   : > { %v2761_v36 = vpop.eup %2760 }
 0x833   : > { %v1735_v37 = vmul.f32 %v2761_v36, %v1721_v17 }
 0x835   : > { %v1744_v43 = vmul.f32 %v2328_v40, %v1735_v37 }
 0x836   : > { %v2763_v41 = vpop.eup %2762 }
 0x837   : > { %v1736_v42 = vmul.f32 %v2763_v41, %v1722_v20  ;;  %v1753_v46 = vadd.f32 %v2329_v44, %v1744_v43 }
 0x839   : > { %v1745_v45 = vmul.f32 %v2328_v40, %v1736_v42 }
 0x83b   : > { %v1754_v47 = vadd.f32 %v2329_v44, %v1745_v45 }
 0x83d   : > { %v1755_v48 = vpack.c.bf16 %v1754_v47, %v1753_v46 }
 0x83f   : > { %2515 = vmatmul.mubr.bf16.vlgmr.msra.gmra.mxu0 %v1755_v48 }
 0x8ff   : > { %v1861_v57 = vpop.f32.mrf.mxu0 }
 0x900   : > { %v1862_v58 = vadd.f32 %v2330_v56, %v1861_v57 }
 0x901   : > { %v2516_v59 = vpop.f32.mrf.mxu0 }
 0x902   : > { %v1870_v60 = vmul.f32 0.70710677, %v1862_v58  ;;  %v1868_v5 = vmul.f32 0.5, %v1862_v58 }
 0x903   : > { %v1864_v61 = vpop.f32.mrf.mxu0 }
 0x904   : > { %2764 = verf.f32 %v1870_v60  ;;  %v1865_v62 = vadd.f32 %v2330_v56, %v1864_v61 }
 0x905   : > { %v2517_v63 = vpop.f32.mrf.mxu0 }
 0x906   : > { %v1871_v0 = vmul.f32 0.70710677, %v1865_v62  ;;  %v1869_v6 = vmul.f32 0.5, %v1865_v62 }
 0x908   : > { %2766 = verf.f32 %v1871_v0 }
 0x911   : > { %v2765_v1 = vpop.eup %2764 }
 0x912   : > { %v1874_v2 = vadd.f32 1.0, %v2765_v1 }
 0x914   : > { %v1876_v9 = vmul.f32 %v1874_v2, %v1868_v5 }
 0x915   : > { %v2767_v4 = vpop.eup %2766 }
 0x916   : > { %v1875_v7 = vadd.f32 1.0, %v2767_v4 }
 0x918   : > { %v1877_v11 = vmul.f32 %v1875_v7, %v1869_v6 }
 0x91a   : > { %v1878_v12 = vpack.c.bf16 %v1877_v11, %v1876_v9 }
 0x91c   : > { %2535 = vmatmul.mubr.bf16.vlgmr.msra.gmra.mxu1 %v1878_v12 }
 0x9dc   : > { %v1984_v15 = vpop.f32.mrf.mxu1 }
 0x9dd   : > { %v1985_v8 = vadd.f32 %v2339_v14, %v1984_v15 }
 0x9de   : > { %v2536_v38 = vpop.f32.mrf.mxu1 }
 0x9df   : > { %v1991_v16 = vadd.f32 %v1985_v8, %v3464_v10 }
 0x9e0   : > { %v1987_v17 = vpop.f32.mrf.mxu1 }
 0x9e1   : > { %1993 = vst [vmem:[#allocation2] sm:$0xff] %v1991_v16  ;;  %v1988_v18 = vadd.f32 %v2339_v14, %v1987_v17  ;;  %1998 = sbr.rel (%p2348_p11) target bundleno = 2847 (0xb1f), region = 96 }
 0x9e2   : > { %v2537_v39 = vpop.f32.mrf.mxu1 }
 0x9e3   : > { %v1992_v19 = vadd.f32 %v1988_v18, %v3468_v13 }
 0x9e5   : > { %1994 = vst [vmem:[#allocation2 + $0x8] sm:$0xff] %v1992_v19 }
 0x9e6   : > { %1999 = vadd.xlane.f32.xlu0 %v1991_v16  ;;  %v2349_v35 = vld [vmem:[%s3610_s29] ss:$0 sm:$0xff] }
 0x9ea   : > { %2001 = vadd.xlane.f32.xlu0 %v1992_v19 }
 0xa6f   : > { %v2000_v20 = vpop.xlane.xlu0 %1999 }
 0xa70   : > { %v2003_v21 = vmul.f32 0.03125, %v2000_v20 }
 0xa72   : > { %v2005_v22 = vsub.f32 %v1991_v16, %v2003_v21 }
 0xa73   : > { %v2002_v23 = vpop.xlane.xlu0 %2001 }
 0xa74   : > { %v2007_v24 = vmul.f32 %v3286_v3, %v2005_v22  ;;  %v2004_v25 = vmul.f32 0.03125, %v2002_v23 }
 0xa76   : > { %v2006_v10 = vsub.f32 %v1992_v19, %v2004_v25  ;;  %v2009_v26 = vmul.f32 %v2007_v24, %v2007_v24 }
 0xa78   : > { %v2008_v27 = vmul.f32 %v3286_v3, %v2006_v10  ;;  %2011 = vadd.xlane.f32.xlu1 %v2009_v26  ;;  %v2350_v3 = vld [vmem:[%s3611_s11] ss:$0 sm:$0xff] }
 0xa7a   : > { %v2010_v28 = vmul.f32 %v2008_v27, %v2008_v27 }
 0xa7c   : > { %2013 = vadd.xlane.f32.xlu1 %v2010_v28 }
 0xb01   : > { %v2012_v13 = vpop.xlane.xlu1 %2011 }
 0xb02   : > { %v2015_v29 = vmul.f32 0.03125, %v2012_v13 }
 0xb04   : > { %v2017_v30 = vadd.f32 1e-05, %v2015_v29 }
 0xb05   : > { %v2014_v31 = vpop.xlane.xlu1 %2013 }
 0xb06   : > { %2768 = vrsqrt.f32 %v2017_v30  ;;  %v2016_v32 = vmul.f32 0.03125, %v2014_v31 }
 0xb08   : > { %v2018_v33 = vadd.f32 1e-05, %v2016_v32 }
 0xb0a   : > { %2770 = vrsqrt.f32 %v2018_v33 }
 0xb13   : > { %v2769_v34 = vpop.eup %2768 }
 0xb14   : > { %v2021_v36 = vmul.f32 %v2769_v34, %v2007_v24 }
 0xb16   : > { %v2030_v37 = vmul.f32 %v2349_v35, %v2021_v36 }
 0xb17   : > { %v2771_v40 = vpop.eup %2770 }
 0xb18   : > { %v2039_v41 = vadd.f32 %v2350_v3, %v2030_v37  ;;  %v2022_v42 = vmul.f32 %v2771_v40, %v2008_v27 }
 0xb1a   : > { %2041 = vst [vmem:[#allocation12] sm:$0xff] %v2039_v41  ;;  %v2031_v43 = vmul.f32 %v2349_v35, %v2022_v42 }
 0xb1c   : > { %v2040_v44 = vadd.f32 %v2350_v3, %v2031_v43 }
 0xb1e   : > { %2042 = vst [vmem:[#allocation12 + $0x8] sm:$0xff] %v2040_v44 }
 0xb1f PF: > { %p2577_p0 = scmp.eq.s32.totalorder %s3174_s23, 1  ;;  %s3012_s30 = smov [#allocation12]  }
 0xb20   : > { %s2052_s19 = sshll.u32 %s3012_s30, 4  ;;  %s2053_s19 = int_to_ptr.vmem [resolvable:$true] %s2052_s19 }
 0xb21   : > { %s2910_s21 = scalar_lea.vmem %s2053_s19, 256  ;;  %p2917_p3 = scmp.lt.s32.totalorder %s2053_s19, %s2053_s19 }
 0xb22   : > { %p2911_p1 = scmp.ne.s32.totalorder %s2053_s19, %s2910_s21  ;;  %p2918_p2 = scmp.lt.s32.totalorder %s2910_s21, %s2910_s21 }
 0xb24   : > { %p2912_p12 = pnand %p2911_p1, %p2577_p0  ;;  %p2919_p4 = por %p2918_p2, %p2917_p3 }
 0xb26   : > { %p2913_p13 = pneg %p2912_p12 }
 0xb28   : > { %p2920_p5 = pnand %p2919_p4, %p2913_p13 }
 0xb2a   : > { %2923 = shalt.err (!%p2920_p5)
}
 0xb2b   : > { %s3013_s10 = smov 128   ;;  %s3014_s9 = smov 8  }
 0xb2c   : > { %s3612_s14 = sld [smem:[#allocation27_spill]] }
 0xb32   : > { %2554 = dma.vmem_to_hbm [thread:$0]  (%p2577_p0), %s2053_s19, 256, %s3612_s14, [#allocation5], %s3013_s10, %s3013_s10, %s3014_s9  }
 0xb33   : > { %2971 = dma.done.wait (%p2577_p0), [#allocation5], 256  }
 0xb34   : > { %2973 = vsyncadd (%p2577_p0), [#allocation5], 4294967040 }
 0xb35 PF: > { %s30_s26 = sadd.s32 1, %s2996_s26   ;;  %s3613_s1 = sld [smem:[#allocation17_spill]] }
 0xb36   : > { %p27_p8 = scmp.ge.s32.totalorder %s30_s26, 4   ;;  %s3614_s23 = sld [smem:[#allocation19_spill]] }
 0xb37   : > { %s3615_s13 = sld [smem:[#allocation18_spill]]  ;;  %s3616_s21 = smov %s2980_s22 }
 0xb38   : > { %s3618_s24 = smov %s2992_s25 }
 0xb39   :  { %29 = sbr.rel (!%p27_p8) target bundleno = 17 (0x11), region = 170 }
 0xb3b   : > { %s3617_s22 = smov %s3613_s1 }
 0xb3d   : > { %s3619_s25 = smov %s3615_s13 }
 0xb3e   :  { %2068 = vsyncpa [#allocation4], 1 }
 0xb3f   :  { %2070 = vsyncpa [#allocation4 + $0x1], 1 }
 0xb40   :  { %2071 = vsyncpa [#allocation7], 1 }
 0xb41   :  { %2073 = vsyncpa [#allocation7 + $0x1], 1 }
 0xb42   :  { %2074 = vsyncpa [#allocation10], 1 }
 0xb43   :  { %2076 = vsyncpa [#allocation10 + $0x1], 1 }
 0xb44   :  { %2077 = vsyncpa [#allocation5], 1 }
 0xb45   :  { %2079 = vsyncpa [#allocation5 + $0x1], 1 }

</bundles_post_ra>
